<compile_context>
chip_gen: v7x
topology: tpu7x:2x2x1
jax: 0.10.0
libtpu: 0.0.40
codegen_flags: <defaults>
</compile_context>

<pallas_src>
import functools

import jax
import jax.numpy as jnp
from jax import lax
from jax.experimental import pallas as pl
from jax.experimental.pallas import tpu as pltpu


def _round_up(x, m):
    return ((x + m - 1) // m) * m


def _sublane(dtype):
    # Min sublane multiple for the dtype's packing: 8 for f32, 16 bf16, 32 int8.
    return max(8, 32 // jnp.dtype(dtype).itemsize)


def _largest_divisor_tile(extent, unit, cap):
    """Largest multiple of `unit` that divides `extent` and is <= cap."""
    cap = min(cap, extent)
    best = unit
    t = unit
    while t <= cap:
        if extent % t == 0:
            best = t
        t += unit
    return best


def _tile_plan(B, Din, Dout, dtype, tb_max=256, tn_max=512, tk_max=1024):
    """Pad to hardware minimums first, then pick tiles as divisors of the
    padded extents (no rounding the extents up to the tile caps)."""
    sub = _sublane(dtype)
    Bp = _round_up(B, sub)
    Kp = _round_up(Din, 128)
    Np = _round_up(Dout, 128)
    tb = _largest_divisor_tile(Bp, sub, tb_max)
    tk = _largest_divisor_tile(Kp, 128, tk_max)
    tn = _largest_divisor_tile(Np, 128, tn_max)
    # Small-problem megacore help (v7x has 2 TensorCores): ensure at least one
    # "parallel" grid axis has >= 2 blocks when the shape allows it.
    if Bp == tb and Np == tn and Np >= 256:
        tn = _largest_divisor_tile(Np, 128, Np - 128)
    return tb, tn, tk, Bp, Kp, Np


def _mix32(x):
    """Cheap 32-bit integer finalizer (xorshift-multiply)."""
    x = x ^ (x >> 16)
    x = x * jnp.uint32(0x7FEB352D)
    x = x ^ (x >> 15)
    x = x * jnp.uint32(0x846CA68B)
    x = x ^ (x >> 16)
    return x


def _keep_mask(row_idx, col_idx, seed_u32, p):
    """Keep mask with P(keep) = 1 - p from global weight coordinates.

    row_idx: (R, 1) uint32 output-feature (Dout) indices.
    col_idx: (1, C) uint32 input-feature (Din) indices.
    The per-axis hashes are tiny vectors; only the final combine
    (xor + one mul + shift + cmp) is per-element work.  Shared by the kernel
    and the pure-JAX reference so they are bit-identical.  Not a calibrated
    PRNG, but plenty uniform for dropout.
    """
    hr = _mix32(row_idx * jnp.uint32(0x9E3779B9) + seed_u32)
    hc = _mix32(col_idx * jnp.uint32(0x85EBCA6B) + (seed_u32 ^ jnp.uint32(0x5F356495)))
    h = hr ^ hc                      # broadcast to (R, C)
    h = h * jnp.uint32(0xC2B2AE35)   # one int mul per element
    h = h ^ (h >> 16)
    thr = jnp.uint32(min(int(round(p * 4294967296.0)), 4294967295))
    return h >= thr


def _wdrop_linear_kernel(seed_ref, x_ref, w_ref, b_ref, o_ref, acc_ref, *,
                         p, training, tn, tk, mxu_dtype):
    """Grid = (B tiles, N tiles, K tiles); K is the reduction (last, 'arbitrary')."""
    j = pl.program_id(1)
    k = pl.program_id(2)

    w = w_ref[...]   # (tn, tk) block of W in its native [Dout, Din] layout
    x = x_ref[...]   # (tb, tk)

    if training and 0.0 < p < 1.0:
        # Factored hash: a (tn,1) and a (1,tk) index vector per step, combined
        # element-wise.  Depends only on global weight coordinates + seed, so
        # identical for every batch tile and independent of the tile plan.
        rows = (lax.broadcasted_iota(jnp.int32, (tn, 1), 0) + j * tn).astype(jnp.uint32)
        cols = (lax.broadcasted_iota(jnp.int32, (1, tk), 1) + k * tk).astype(jnp.uint32)
        keep = _keep_mask(rows, cols, seed_ref[0].astype(jnp.uint32), p)
        # Only the select here; the 1/(1-p) scale is folded into the (much
        # smaller) output tile at finalize.
        w = jnp.where(keep, w, jnp.zeros_like(w))

    if mxu_dtype is not None:
        x = x.astype(mxu_dtype)
        w = w.astype(mxu_dtype)

    # x @ W_blk.T on the MXU (contraction over Din), f32 accumulation.
    partial = lax.dot_general(x, w, (((1,), (1,)), ((), ())),
                              preferred_element_type=jnp.float32)

    @pl.when(k == 0)
    def _first():
        acc_ref[...] = partial       # direct write: saves a zero-fill pass

    @pl.when(k > 0)
    def _rest():
        acc_ref[...] += partial

    @pl.when(k == pl.num_programs(2) - 1)
    def _finalize():
        y = acc_ref[...]
        if training and 0.0 < p < 1.0:
            y = y * jnp.float32(1.0 / (1.0 - p))
        y = y + b_ref[...].astype(jnp.float32)
        o_ref[...] = y.astype(o_ref.dtype)


def weight_dropout_linear(x, w_raw, b, seed, *, p=0.5, training=True,
                          tb_max=256, tn_max=512, tk_max=1024, mxu_dtype=None):
    """WeightDropout(nn.Linear(Din, Dout), [('weight',)], dropout=p)(x).

    x: [B, Din]; w_raw: [Dout, Din] (PyTorch nn.Linear layout); b: [Dout].
    """
    B, Din = x.shape
    Dout, Din_w = w_raw.shape
    assert Din == Din_w
    p = float(p)
    training = bool(training)

    # PyTorch F.dropout(p=1, training=True) zeroes the weight -> output is bias.
    if training and p >= 1.0:
        return jnp.broadcast_to(b.astype(x.dtype), (B, Dout))

    tb, tn, tk, Bp, Kp, Np = _tile_plan(B, Din, Dout, x.dtype,
                                        tb_max, tn_max, tk_max)

    # Pad only when the logical shape is not already tile-aligned; in the
    # common 128-aligned case there are NO extra HBM passes over W or x.
    # (For production, hoist any W pad to parameter-creation time.)
    xp = x if (Bp, Kp) == x.shape else jnp.pad(x, ((0, Bp - B), (0, Kp - Din)))
    wp = (w_raw if (Np, Kp) == w_raw.shape
          else jnp.pad(w_raw, ((0, Np - Dout), (0, Kp - Din))))
    bp = b.reshape(1, Dout)
    if Np != Dout:
        bp = jnp.pad(bp, ((0, 0), (0, Np - Dout)))
    seed_arr = jnp.asarray([seed], dtype=jnp.int32)

    grid = (Bp // tb, Np // tn, Kp // tk)

    kernel = functools.partial(_wdrop_linear_kernel, p=p, training=training,
                               tn=tn, tk=tk, mxu_dtype=mxu_dtype)

    out = pl.pallas_call(
        kernel,
        out_shape=jax.ShapeDtypeStruct((Bp, Np), x.dtype),
        grid_spec=pltpu.PrefetchScalarGridSpec(
            num_scalar_prefetch=1,                       # seed -> SMEM
            grid=grid,
            in_specs=[
                pl.BlockSpec((tb, tk), lambda i, j, k, s: (i, k)),  # x
                pl.BlockSpec((tn, tk), lambda i, j, k, s: (j, k)),  # W [Dout, Din]
                pl.BlockSpec((1, tn), lambda i, j, k, s: (0, j)),   # bias
            ],
            out_specs=pl.BlockSpec((tb, tn), lambda i, j, k, s: (i, j)),
            scratch_shapes=[pltpu.VMEM((tb, tn), jnp.float32)],     # f32 acc
        ),
        compiler_params=pltpu.CompilerParams(
            dimension_semantics=("parallel", "parallel", "arbitrary"),
        ),
    )(seed_arr, xp, wp, bp)

    if (Bp, Np) != (B, Dout):
        out = out[:B, :Dout]
    return out


def weight_dropout_linear_ref(x, w_raw, b, seed, *, p=0.5, training=True):
    """Pure-JAX reference replaying the exact same hash-based mask."""
    B, Din = x.shape
    Dout = w_raw.shape[0]
    p = float(p)
    if training and p >= 1.0:
        return jnp.broadcast_to(b.astype(x.dtype), (B, Dout))
    if training and 0.0 < p < 1.0:
        rows = lax.broadcasted_iota(jnp.int32, (Dout, 1), 0).astype(jnp.uint32)
        cols = lax.broadcasted_iota(jnp.int32, (1, Din), 1).astype(jnp.uint32)
        keep = _keep_mask(rows, cols, jnp.uint32(seed), p)
        w = jnp.where(keep, w_raw, jnp.zeros_like(w_raw)) * jnp.float32(1.0 / (1.0 - p))
    else:
        w = w_raw
    y = jnp.dot(x, w.T, precision=lax.Precision.HIGHEST) + b
    return y.astype(x.dtype)


if __name__ == "__main__":
    key = jax.random.PRNGKey(0)
    k_x, k_w, k_b = jax.random.split(key, 3)

    # Small shapes, but large enough to exercise N tiling (Dout=640 -> 5 lane-
    # dense N tiles of 128 with ZERO padding waste) and the K reduction path.
    batch, in_features, out_features = 16, 1024, 640
    p = 0.5
    seed = 42

    x = jax.random.normal(k_x, (batch, in_features), dtype=jnp.float32)
    w_raw = jax.random.normal(k_w, (out_features, in_features), dtype=jnp.float32) * 0.05
    b = jax.random.normal(k_b, (out_features,), dtype=jnp.float32) * 0.1

    # Training mode: dropout mask generated on-chip inside the kernel.
    y_train = jax.block_until_ready(
        weight_dropout_linear(x, w_raw, b, seed, p=p, training=True))
    assert y_train.shape == (batch, out_features)
    y_train_ref = weight_dropout_linear_ref(x, w_raw, b, seed, p=p, training=True)
    max_err = float(jnp.max(jnp.abs(y_train - y_train_ref)))
    assert jnp.allclose(y_train, y_train_ref, atol=3e-2, rtol=1e-2), max_err

    # Keep-rate sanity check on the shared mask (~= 1 - p).
    rows = lax.broadcasted_iota(jnp.int32, (out_features, 1), 0).astype(jnp.uint32)
    cols = lax.broadcasted_iota(jnp.int32, (1, in_features), 1).astype(jnp.uint32)
    frac = float(jnp.mean(_keep_mask(rows, cols, jnp.uint32(seed), p)
                          .astype(jnp.float32)))
    assert abs(frac - (1.0 - p)) < 0.05, frac

    # Eval mode: dropout is the identity; kernel reduces to x @ W.T + b.
    y_eval = jax.block_until_ready(
        weight_dropout_linear(x, w_raw, b, seed, p=p, training=False))
    y_eval_ref = jnp.dot(x, w_raw.T, precision=lax.Precision.HIGHEST) + b
    assert jnp.allclose(y_eval, y_eval_ref, atol=3e-2, rtol=1e-2)

    # p = 1.0 edge case: all weights dropped -> output equals the bias.
    y_p1 = jax.block_until_ready(
        weight_dropout_linear(x, w_raw, b, seed, p=1.0, training=True))
    assert jnp.allclose(y_p1, jnp.broadcast_to(b, (batch, out_features)))

    print("KERNEL_OK")
</pallas_src>

<mosaic_0001>
module attributes {stable_mosaic.version = 11 : i64} {
  func.func @_wdrop_linear_kernel(%arg0: i32, %arg1: i32, %arg2: i32, %arg3: memref<1xi32, #tpu.memory_space<smem>>, %arg4: memref<16x1024xf32, #tpu.memory_space<vmem>>, %arg5: memref<128x1024xf32, #tpu.memory_space<vmem>>, %arg6: memref<1x128xf32, #tpu.memory_space<vmem>>, %arg7: memref<16x128xf32, #tpu.memory_space<vmem>>, %arg8: memref<16x128xf32, #tpu.memory_space<vmem>>) attributes {dimension_semantics = [#tpu.dimension_semantics<parallel>, #tpu.dimension_semantics<parallel>, #tpu.dimension_semantics<arbitrary>], iteration_bounds = array<i64: 1, 5, 1>, scalar_prefetch = 1 : i64, scratch_operands = 1 : i64, tpu.core_type = #tpu.core_type<tc>, window_params = [{transform_indices = @transform_0, window_bounds = array<i64: 16, 1024>}, {transform_indices = @transform_1, window_bounds = array<i64: 128, 1024>}, {transform_indices = @transform_2, window_bounds = array<i64: 1, 128>}, {transform_indices = @transform_3, window_bounds = array<i64: 16, 128>}]} {
    %c0 = arith.constant 0 : index
    %c0_0 = arith.constant 0 : index
    %0 = vector.load %arg5[%c0, %c0_0] : memref<128x1024xf32, #tpu.memory_space<vmem>>, vector<128x1024xf32>
    %c0_1 = arith.constant 0 : index
    %c0_2 = arith.constant 0 : index
    %1 = vector.load %arg4[%c0_1, %c0_2] : memref<16x1024xf32, #tpu.memory_space<vmem>>, vector<16x1024xf32>
    %2 = tpu.iota {dimensions = array<i32: 0>} : vector<128x1xi32>
    %c128_i32 = arith.constant 128 : i32
    %3 = arith.muli %arg1, %c128_i32 : i32
    %4 = vector.broadcast %3 : i32 to vector<128x1xi32>
    %5 = arith.addi %2, %4 : vector<128x1xi32>
    %6 = tpu.iota {dimensions = array<i32: 1>} : vector<1x1024xi32>
    %c1024_i32 = arith.constant 1024 : i32
    %7 = arith.muli %arg2, %c1024_i32 : i32
    %8 = vector.broadcast %7 : i32 to vector<1x1024xi32>
    %9 = arith.addi %6, %8 : vector<1x1024xi32>
    %c0_3 = arith.constant 0 : index
    %10 = memref.load %arg3[%c0_3] : memref<1xi32, #tpu.memory_space<smem>>
    %c-1640531527_i32 = arith.constant -1640531527 : i32
    %11 = vector.broadcast %c-1640531527_i32 : i32 to vector<128x1xi32>
    %12 = arith.muli %5, %11 : vector<128x1xi32>
    %13 = vector.broadcast %10 : i32 to vector<128x1xi32>
    %14 = arith.addi %12, %13 : vector<128x1xi32>
    %c16_i32 = arith.constant 16 : i32
    %15 = vector.broadcast %c16_i32 : i32 to vector<128x1xi32>
    %16 = arith.shrui %14, %15 : vector<128x1xi32>
    %17 = arith.xori %14, %16 : vector<128x1xi32>
    %c2146121005_i32 = arith.constant 2146121005 : i32
    %18 = vector.broadcast %c2146121005_i32 : i32 to vector<128x1xi32>
    %19 = arith.muli %17, %18 : vector<128x1xi32>
    %c15_i32 = arith.constant 15 : i32
    %20 = vector.broadcast %c15_i32 : i32 to vector<128x1xi32>
    %21 = arith.shrui %19, %20 : vector<128x1xi32>
    %22 = arith.xori %19, %21 : vector<128x1xi32>
    %c-2073254261_i32 = arith.constant -2073254261 : i32
    %23 = vector.broadcast %c-2073254261_i32 : i32 to vector<128x1xi32>
    %24 = arith.muli %22, %23 : vector<128x1xi32>
    %c16_i32_4 = arith.constant 16 : i32
    %25 = vector.broadcast %c16_i32_4 : i32 to vector<128x1xi32>
    %26 = arith.shrui %24, %25 : vector<128x1xi32>
    %27 = arith.xori %24, %26 : vector<128x1xi32>
    %c-2048144789_i32 = arith.constant -2048144789 : i32
    %28 = vector.broadcast %c-2048144789_i32 : i32 to vector<1x1024xi32>
    %29 = arith.muli %9, %28 : vector<1x1024xi32>
    %c1597334677_i32 = arith.constant 1597334677 : i32
    %30 = arith.xori %10, %c1597334677_i32 : i32
    %31 = vector.broadcast %30 : i32 to vector<1x1024xi32>
    %32 = arith.addi %29, %31 : vector<1x1024xi32>
    %c16_i32_5 = arith.constant 16 : i32
    %33 = vector.broadcast %c16_i32_5 : i32 to vector<1x1024xi32>
    %34 = arith.shrui %32, %33 : vector<1x1024xi32>
    %35 = arith.xori %32, %34 : vector<1x1024xi32>
    %c2146121005_i32_6 = arith.constant 2146121005 : i32
    %36 = vector.broadcast %c2146121005_i32_6 : i32 to vector<1x1024xi32>
    %37 = arith.muli %35, %36 : vector<1x1024xi32>
    %c15_i32_7 = arith.constant 15 : i32
    %38 = vector.broadcast %c15_i32_7 : i32 to vector<1x1024xi32>
    %39 = arith.shrui %37, %38 : vector<1x1024xi32>
    %40 = arith.xori %37, %39 : vector<1x1024xi32>
    %c-2073254261_i32_8 = arith.constant -2073254261 : i32
    %41 = vector.broadcast %c-2073254261_i32_8 : i32 to vector<1x1024xi32>
    %42 = arith.muli %40, %41 : vector<1x1024xi32>
    %c16_i32_9 = arith.constant 16 : i32
    %43 = vector.broadcast %c16_i32_9 : i32 to vector<1x1024xi32>
    %44 = arith.shrui %42, %43 : vector<1x1024xi32>
    %45 = arith.xori %42, %44 : vector<1x1024xi32>
    %46 = vector.broadcast %27 : vector<128x1xi32> to vector<128x1024xi32>
    %47 = vector.broadcast %45 : vector<1x1024xi32> to vector<128x1024xi32>
    %48 = arith.xori %46, %47 : vector<128x1024xi32>
    %c-1028477387_i32 = arith.constant -1028477387 : i32
    %49 = vector.broadcast %c-1028477387_i32 : i32 to vector<128x1024xi32>
    %50 = arith.muli %48, %49 : vector<128x1024xi32>
    %c16_i32_10 = arith.constant 16 : i32
    %51 = vector.broadcast %c16_i32_10 : i32 to vector<128x1024xi32>
    %52 = arith.shrui %50, %51 : vector<128x1024xi32>
    %53 = arith.xori %50, %52 : vector<128x1024xi32>
    %c-2147483648_i32 = arith.constant -2147483648 : i32
    %54 = vector.broadcast %c-2147483648_i32 : i32 to vector<128x1024xi32>
    %55 = arith.cmpi uge, %53, %54 : vector<128x1024xi32>
    %cst = arith.constant 0.000000e+00 : f32
    %56 = vector.broadcast %cst : f32 to vector<128x1024xf32>
    %57 = arith.select %55, %0, %56 : vector<128x1024xi1>, vector<128x1024xf32>
    %cst_11 = arith.constant dense<0.000000e+00> : vector<16x128xf32>
    %58 = tpu.matmul %1, %57, %cst_11 {dimension_numbers = #tpu.dot_dimension_numbers<[1], [1], [0], [0], [0, 0, 1, 0], [], []>} : vector<16x1024xf32>, vector<128x1024xf32>, vector<16x128xf32> -> vector<16x128xf32>
    %c0_i32 = arith.constant 0 : i32
    %59 = arith.cmpi eq, %arg2, %c0_i32 : i32
    %60 = arith.extui %59 : i1 to i32
    %c0_i32_12 = arith.constant 0 : i32
    %61 = arith.cmpi ne, %60, %c0_i32_12 : i32
    scf.if %61 {
      %c0_17 = arith.constant 0 : index
      %c0_18 = arith.constant 0 : index
      %68 = vector.load %arg8[%c0_17, %c0_18] : memref<16x128xf32, #tpu.memory_space<vmem>>, vector<16x128xf32>
      tpu.vector_store %arg8[%c0_17, %c0_18], %58 {strides = array<i32>} : memref<16x128xf32, #tpu.memory_space<vmem>>, vector<16x128xf32>,
    } else {
    }
    %c0_i32_13 = arith.constant 0 : i32
    %62 = arith.cmpi sgt, %arg2, %c0_i32_13 : i32
    %63 = arith.extui %62 : i1 to i32
    %c0_i32_14 = arith.constant 0 : i32
    %64 = arith.cmpi ne, %63, %c0_i32_14 : i32
    scf.if %64 {
      %c0_17 = arith.constant 0 : index
      %c0_18 = arith.constant 0 : index
      %68 = vector.load %arg8[%c0_17, %c0_18] : memref<16x128xf32, #tpu.memory_space<vmem>>, vector<16x128xf32>
      %69 = arith.addf %68, %58 : vector<16x128xf32>
      %c0_19 = arith.constant 0 : index
      %c0_20 = arith.constant 0 : index
      %70 = vector.load %arg8[%c0_19, %c0_20] : memref<16x128xf32, #tpu.memory_space<vmem>>, vector<16x128xf32>
      tpu.vector_store %arg8[%c0_19, %c0_20], %69 {strides = array<i32>} : memref<16x128xf32, #tpu.memory_space<vmem>>, vector<16x128xf32>,
    } else {
    }
    %c0_i32_15 = arith.constant 0 : i32
    %65 = arith.cmpi eq, %arg2, %c0_i32_15 : i32
    %66 = arith.extui %65 : i1 to i32
    %c0_i32_16 = arith.constant 0 : i32
    %67 = arith.cmpi ne, %66, %c0_i32_16 : i32
    scf.if %67 {
      %c0_17 = arith.constant 0 : index
      %c0_18 = arith.constant 0 : index
      %68 = vector.load %arg8[%c0_17, %c0_18] : memref<16x128xf32, #tpu.memory_space<vmem>>, vector<16x128xf32>
      %cst_19 = arith.constant 2.000000e+00 : f32
      %69 = vector.broadcast %cst_19 : f32 to vector<16x128xf32>
      %70 = arith.mulf %68, %69 : vector<16x128xf32>
      %c0_20 = arith.constant 0 : index
      %c0_21 = arith.constant 0 : index
      %71 = vector.load %arg6[%c0_20, %c0_21] : memref<1x128xf32, #tpu.memory_space<vmem>>, vector<1x128xf32>
      %72 = vector.broadcast %71 : vector<1x128xf32> to vector<16x128xf32>
      %73 = arith.addf %70, %72 : vector<16x128xf32>
      %c0_22 = arith.constant 0 : index
      %c0_23 = arith.constant 0 : index
      %74 = vector.load %arg7[%c0_22, %c0_23] : memref<16x128xf32, #tpu.memory_space<vmem>>, vector<16x128xf32>
      tpu.vector_store %arg7[%c0_22, %c0_23], %73 {strides = array<i32>} : memref<16x128xf32, #tpu.memory_space<vmem>>, vector<16x128xf32>,
    } else {
    }
    return
  }
  func.func @transform_0(%arg0: i32, %arg1: i32, %arg2: i32, %arg3: memref<1xi32, #tpu.memory_space<smem>>) -> (i32, i32) {
    %c0_i32 = arith.constant 0 : i32
    return %arg0, %arg2 : i32, i32
  }
  func.func @transform_1(%arg0: i32, %arg1: i32, %arg2: i32, %arg3: memref<1xi32, #tpu.memory_space<smem>>) -> (i32, i32) {
    %c0_i32 = arith.constant 0 : i32
    return %arg1, %arg2 : i32, i32
  }
  func.func @transform_2(%arg0: i32, %arg1: i32, %arg2: i32, %arg3: memref<1xi32, #tpu.memory_space<smem>>) -> (i32, i32) {
    %c0_i32 = arith.constant 0 : i32
    %c0_i32_0 = arith.constant 0 : i32
    return %c0_i32, %arg1 : i32, i32
  }
  func.func @transform_3(%arg0: i32, %arg1: i32, %arg2: i32, %arg3: memref<1xi32, #tpu.memory_space<smem>>) -> (i32, i32) {
    %c0_i32 = arith.constant 0 : i32
    return %arg0, %arg1 : i32, i32
  }
}

</mosaic_0001>

<bundles_post_ra>
// kernel: tpu_custom_call.1
= control target key start
LH: loop header
LB: loop body
LE: loop exit
PB: predicated region body
PF: predicated region fallthrough
CT: control target
= control target key end

     0   :  { %s3818_s0 = inlined_call_operand.<no memory space> [shape: s32[1], index: 0, kind: input, shape index: {}]   ;;  %s3819_s1 = inlined_call_operand.hbm [shape: f32[16,1024], index: 1, kind: input, shape index: {}]   ;;  %s3820_s2 = inlined_call_operand.hbm [shape: f32[640,1024], index: 2, kind: input, shape index: {}]   ;;  %s3821_s3 = inlined_call_operand.hbm [shape: f32[1,640], index: 3, kind: input, shape index: {}]   ;;  %s3822_s4 = inlined_call_operand.hbm [shape: f32[16,640], index: 4, kind: output, shape index: {}]  }
   0x1   :  { %3855 = sst [smem:[#allocation28_spill]] %s3820_s2 }
   0x2   :  { %9 = sst [smem:[#allocation4]] %s3818_s0 }
   0x3   :  { %10 = vsyncpa [#allocation6], 0 }
   0x4   :  { %11 = vsyncpa [#allocation9], 0 }
   0x5   :  { %13 = vsyncpa [#allocation9 + $0x1], 0 }
   0x6   :  { %14 = vsyncpa [#allocation7], 0 }
   0x7   :  { %16 = vsyncpa [#allocation7 + $0x1], 0  ;;  %s2612_s17 = smov 0   ;;  %s2614_s18 = smov 0  }
   0x8   :  { %s2616_s19 = smov 0   ;;  %s2618_s20 = smov 0  }
   0x9   :  { %s2620_s21 = smov 0   ;;  %s2622_s22 = smov 0  }
   0xa LB: > { %s37_s0 = sadd.s32 1, %s2569_s21  ;;  %s78_s23 = sadd.s32 1, %s2561_s19  ;;  %s2573_s22 = sphi %s2622_s22, %s22_s22   ;;  %s2569_s21 = sphi %s2620_s21, %s3944_s21   ;;  %s2565_s20 = sphi %s2618_s20, %s3943_s20   ;;  %s2561_s19 = sphi %s2616_s19, %s3942_s19   ;;  %s2557_s18 = sphi %s2614_s18, %s3941_s18   ;;  %s2553_s17 = sphi %s2612_s17, %s3940_s17  }
   0xb   : > { %p39_p0 = scmp.ge.s32.totalorder %s37_s0, 5  ;;  %p85_p1 = scmp.ne.s32.totalorder %s2561_s19, %s2557_s18 }
   0xc   : > { %p86_p2 = scmp.eq.s32.totalorder %s2573_s22, 0  ;;  %p2342_p5 = scmp.lt.s32.totalorder %s2573_s22, 5 }
   0xd   : > { %s3946_s0 = smov (%p39_p0, %s37_s0), 0  ;;  %s188_s26 = sand.u32 1, %s2573_s22  }
   0xe   : > { %p2652_p3 = por %p86_p2, %p85_p1  ;;  %s73_s25 = ssub.s32 %s2569_s21, %s3946_s0 }
   0xf   : > { %p76_p4 = scmp.eq.s32.totalorder %s73_s25, 0  ;;  %s190_s27 = sand.u32 1, %s2561_s19  }
  0x10   : > { %s1969_s29 = sshll.u32 %s190_s27, 10  ;;  %s2113_s30 = sshll.u32 %s2569_s21, 14 }
  0x11   : > { %s2662_s28 = scalar_select %p76_p4, %s2561_s19, %s78_s23  }
  0x12   : > { %s3857_s2 = sld [smem:[#allocation28_spill]]  ;;  %s192_s8 = scalar_lea.vmem [#allocation8], %s1969_s29 }
  0x13   : > { %s202_s9 = sshll.u32 %s192_s8, 4  ;;  %p2676_p6 = pnand %p2342_p5, %p2652_p3  ;;  %s2672_s9 = int_to_ptr.vmem [resolvable:$true] %s202_s9 }
  0x14   : > { %s2680_s11 = scalar_lea.sflag [#allocation9], %s188_s26 }
  0x15   : > { %p2401_p8 = pneg %p2676_p6 }
  0x18   : > { %s2670_s7 = scalar_lea.hbm %s3857_s2, %s2113_s30  ;;  %s2404_s15 = scalar_lea.hbm %s3857_s2, 81920 }
  0x19   : > { %s2399_s12 = scalar_lea.hbm %s2670_s7, 16384  ;;  %p2405_p11 = scmp.lt.u32.totalorder %s2670_s7, %s3857_s2 }
  0x1a   : > { %p2400_p7 = scmp.ne.s32.totalorder %s2670_s7, %s2399_s12  ;;  %p2406_p12 = scmp.lt.u32.totalorder %s2404_s15, %s2399_s12 }
  0x1b   : > { %p2408_p0 = scmp.lt.u32.totalorder %s2399_s12, %s2670_s7 }
  0x1c   : > { %p2402_p9 = pnand %p2401_p8, %p2400_p7  ;;  %p2407_p13 = por %p2406_p12, %p2405_p11 }
  0x1e   : > { %p2403_p10 = pneg %p2402_p9  ;;  %p2409_p2 = por %p2408_p0, %p2407_p13 }
  0x20   : > { %p2410_p3 = pnand %p2409_p2, %p2403_p10 }
  0x22   : > { %2413 = shalt.err (!%p2410_p3)
}
  0x23   : > { %s2414_s24 = scalar_lea.vmem %s2672_s9, 16384  ;;  %s2575_s25 = smov [#allocation8]  }
  0x24   : > { %p2415_p4 = scmp.ne.s32.totalorder %s2672_s9, %s2414_s24  ;;  %s2419_s26 = sshll.u32 %s2575_s25, 4  ;;  %s2420_s26 = int_to_ptr.vmem [resolvable:$false] %s2419_s26 }
  0x25   : > { %s2421_s29 = scalar_lea.vmem %s2420_s26, 32768  ;;  %p2422_p9 = scmp.lt.s32.totalorder %s2672_s9, %s2420_s26 }
  0x26   : > { %p2417_p5 = pnand %p2415_p4, %p2401_p8  ;;  %p2423_p11 = scmp.lt.s32.totalorder %s2421_s29, %s2414_s24 }
  0x28   : > { %p2418_p7 = pneg %p2417_p5  ;;  %p2424_p12 = por %p2423_p11, %p2422_p9 }
  0x2a   : > { %p2425_p13 = pnand %p2424_p12, %p2418_p7 }
  0x2c   : > { %2428 = shalt.err (!%p2425_p13)
}
  0x2d   : > { %s3823_s30 = smov 1024   ;;  %s3824_s5 = smov 64  }
  0x2e   : > { %2333 = dma.hbm_to_vmem [thread:$0]  (!%p2676_p6), %s2670_s7, 16384, %s2672_s9, %s2680_s11, %s3823_s30, %s3823_s30, %s3824_s5  }
  0x2f   : > { %s2712_s6 = sadd.s32 4294967295, %s2573_s22   ;;  %s1965_s8 = sadd.s32 4294967294, %s2573_s22  }
  0x30   : > { %p91_p10 = scmp.ne.s32.totalorder %s2557_s18, %s2553_s17  ;;  %p3825_p0 = scmp.eq.s32.totalorder %s2712_s6, 0 }
  0x31   : > { %p143_p2 = scmp.eq.s32.totalorder %s2712_s6, 4  ;;  %p149_p3 = scmp.eq.s32.totalorder %s1965_s8, 4 }
  0x32   : > { %p1966_p4 = scmp.ge.s32.totalorder %s2573_s22, 1  ;;  %p2722_p5 = por %p3825_p0, %p91_p10 }
  0x33   : > { %p2729_p7 = por %p143_p2, %p85_p1  ;;  %p2733_p9 = por %p149_p3, %p91_p10 }
  0x34   : > { %s3859_s12 = scalar_select %p2722_p5, 1, 0 }
  0x35   : > { %s3860_s7 = scalar_select %p2729_p7, 1, 0 }
  0x36   : > { %s3861_s9 = scalar_select %p2733_p9, 1, 0 }
  0x37   : > { %p156_p11 = scmp.lt.s32.totalorder %s2573_s22, 6  ;;  %s2578_s14 = smov [#allocation5]  }
  0x38   : > { %s174_s15 = sshll.u32 %s2578_s14, 4  ;;  %s1973_s16 = sshll.u32 %s2569_s21, 4  ;;  %s2742_s15 = int_to_ptr.vmem [resolvable:$true] %s174_s15 }
  0x39   : > { %p2738_p12 = pnand %p1966_p4, %p156_p11  ;;  %s2750_s25 = scalar_lea.hbm %s3821_s3, %s1973_s16 }
  0x3a   : > { %s215_s26 = scalar_lea.vmem [#allocation10], %s190_s27  ;;  %s2429_s14 = scalar_lea.hbm %s2750_s25, 16 }
  0x3b   : > { %s3862_s13 = scalar_select %p2738_p12, 1, 0 }
  0x3c   : > { %p2326_p1 = pneg %p2738_p12  ;;  %s222_s29 = sshll.u32 %s215_s26, 4  ;;  %s223_s29 = int_to_ptr.vmem [resolvable:$true] %s222_s29 }
  0x3d   : > { %p2430_p10 = scmp.ne.s32.totalorder %s2750_s25, %s2429_s14  ;;  %s2434_s24 = scalar_lea.hbm %s3821_s3, 80 }
  0x3e   : > { %p2756_p13 = pnand %p2326_p1, %p3825_p0  ;;  %p2435_p4 = scmp.lt.u32.totalorder %s2750_s25, %s3821_s3 }
  0x3f   : > { %p2432_p2 = pnand %p2430_p10, %p2401_p8  ;;  %p2436_p11 = scmp.lt.u32.totalorder %s2434_s24, %s2429_s14 }
  0x40   : > { %s3863_s8 = scalar_select %p2756_p13, 1, 0 }
  0x41   : > { %p2433_p3 = pneg %p2432_p2  ;;  %p2437_p1 = por %p2436_p11, %p2435_p4 }
  0x42   : > { %p2438_p0 = scmp.lt.u32.totalorder %s2429_s14, %s2750_s25 }
  0x44   : > { %p2439_p9 = por %p2438_p0, %p2437_p1 }
  0x46   : > { %p2440_p7 = pnand %p2439_p9, %p2433_p3 }
  0x48   : > { %2443 = shalt.err (!%p2440_p7)
}
  0x49   : > { %s2444_s27 = scalar_lea.vmem %s223_s29, 16  ;;  %s2579_s26 = smov [#allocation10]  }
  0x4a   : > { %p2445_p5 = scmp.ne.s32.totalorder %s223_s29, %s2444_s27  ;;  %s2449_s16 = sshll.u32 %s2579_s26, 4  ;;  %s2450_s16 = int_to_ptr.vmem [resolvable:$false] %s2449_s16 }
  0x4b   : > { %s2451_s23 = scalar_lea.vmem %s2450_s16, 32  ;;  %p2452_p12 = scmp.lt.s32.totalorder %s223_s29, %s2450_s16 }
  0x4c   : > { %p2447_p10 = pnand %p2445_p5, %p2401_p8  ;;  %p2453_p13 = scmp.lt.s32.totalorder %s2451_s23, %s2444_s27 }
  0x4e   : > { %p2448_p2 = pneg %p2447_p10  ;;  %p2454_p4 = por %p2453_p13, %p2452_p12 }
  0x50   : > { %p2455_p11 = pnand %p2454_p4, %p2448_p2 }
  0x52   : > { %2458 = shalt.err (!%p2455_p11)
}
  0x53   : > { %2336 = dma.hbm_to_vmem [thread:$0]  (!%p2676_p6), %s2750_s25, 16, %s223_s29, %s2680_s11  }
  0x54   : > { %s2459_s14 = scalar_lea.hbm %s3819_s1, 2048  ;;  %p3864_p0 = scmp.ne.s32.totalorder %s3863_s8, 0 }
  0x55   : > { %p2460_p8 = scmp.ne.s32.totalorder %s3819_s1, %s2459_s14  ;;  %p2466_p12 = scmp.lt.u32.totalorder %s2459_s14, %s3819_s1 }
  0x56   : > { %p2461_p5 = pneg %p3864_p0 }
  0x58   : > { %p2462_p7 = pnand %p2461_p5, %p2460_p8 }
  0x5a   : > { %p2463_p9 = pneg %p2462_p7 }
  0x5c   : > { %p2468_p13 = pnand %p2466_p12, %p2463_p9 }
  0x5e   : > { %2471 = shalt.err (!%p2468_p13)
}
  0x5f   : > { %s2472_s10 = scalar_lea.vmem %s2742_s15, 2048  ;;  %p2480_p10 = scmp.lt.s32.totalorder %s2742_s15, %s2742_s15 }
  0x60   : > { %p2473_p6 = scmp.ne.s32.totalorder %s2742_s15, %s2472_s10  ;;  %p2481_p2 = scmp.lt.s32.totalorder %s2472_s10, %s2472_s10 }
  0x62   : > { %p2475_p3 = pnand %p2473_p6, %p2461_p5  ;;  %p2482_p4 = por %p2481_p2, %p2480_p10 }
  0x64   : > { %p2476_p1 = pneg %p2475_p3 }
  0x66   : > { %p2483_p11 = pnand %p2482_p4, %p2476_p1 }
  0x68   : > { %2486 = shalt.err (!%p2483_p11)
}
  0x69   : > { %s3865_s2 = smov 64   ;;  %s3866_s11 = smov 1024  }
  0x6a   : > { %2329 = dma.hbm_to_vmem [thread:$0]  (!%p3864_p0), %s3819_s1, 2048, %s2742_s15, [#allocation6], %s3866_s11, %s3866_s11, %s3865_s2  }
  0x6b   : > { %p3867_p8 = scmp.ne.s32.totalorder %s3862_s13, 0 }
  0x6d   : > { %231 = sbr.rel (%p3867_p8) target bundleno = 630 (0x276), region = 32 }
  0x74   : > { %p3868_p5 = scmp.eq.s32.totalorder %s2712_s6, 0 }
  0x76   : > { %2540 = dma.done.wait (%p3868_p5), [#allocation6], 2048   ;;  %p3869_p7 = pmov %p3868_p5 }
  0x77   : > { %s237_s8 = sand.u32 1, %s2712_s6   ;;  %s2812_s16 = sand.u32 1, %s2557_s18  }
  0x78   : > { %2542 = vsyncadd (%p3869_p7), [#allocation6], 4294965248  ;;  %s1976_s23 = sshll.u32 %s2812_s16, 10  ;;  %s238_s30 = scalar_lea.sflag [#allocation9], %s237_s8 }
  0x79   : > { %s2815_s5 = scalar_lea.vmem [#allocation8], %s1976_s23  ;;  %p3870_p0 = scmp.ne.s32.totalorder %s3859_s12, 0 }
  0x7b   : > { %2544 = dma.done.wait (%p3870_p0), %s238_s30, 16400  }
  0x7c   : > { %2546 = vsyncadd (%p3870_p0), %s238_s30, 4294950896  ;;  %v425_v0 = vlaneseq  ;;  %s1978_s13 = sshll.u32 %s2565_s20, 7  ;;  %s479_s6 = sld [smem:[#allocation4]]  ;;  %v2837_v37 = vld [vmem:[%s2815_s5 + $0x8] sm:$0xff] }
  0x7d   : > { %v2824_v1 = vstv %s1978_s13  ;;  %v2840_v38 = vld [vmem:[%s2815_s5 + $0x48] sm:$0xff]  ;;  %s1977_s15 = sshll.u32 %s2812_s16, 4  ;;  %s249_s14 = scalar_lea.vmem [#allocation10], %s2812_s16 }
  0x7e   : > { %v2826_v2 = vshrl.u32 %v425_v0, 7  ;;  %v461_v3 = vand.u32 127, %v425_v0  ;;  %v2114_v54 = vpack.c.bf16 %v2840_v38, %v2837_v37  ;;  %v2853_v63 = vld [vmem:[%s2815_s5 + $0x28] sm:$0xff]  ;;  %s275_s24 = scalar_lea.vmem [#allocation11], %s1977_s15  ;;  %s3770_s2 = scalar_lea.hbm %s3822_s4, %s1978_s13 }
  0x7f   : > { %v2856_v0 = vld [vmem:[%s2815_s5 + $0x68] sm:$0xff]  ;;  %s1841_s27 = sshll.u32 %s275_s24, 4  ;;  %s1826_s11 = scalar_lea.sflag [#allocation7], %s2812_s16  ;;  %s3763_s27 = int_to_ptr.vmem [resolvable:$true] %s1841_s27 }
  0x80   : > { %v427_v4 = vadd.s32 8, %v2826_v2  ;;  %v444_v5 = vadd.s32 %v2824_v1, %v2826_v2  ;;  %v462_v6 = vadd.s32 128, %v461_v3  ;;  %v463_v7 = vadd.s32 256, %v461_v3  ;;  %v2960_v37 = vld [vmem:[%s2815_s5 + $0x148] sm:$0xff]  ;;  %s2487_s25 = scalar_lea.vmem %s3763_s27, 256  ;;  %p3938_p12 = scmp.ne.s32.totalorder %s3860_s7, 0 }
  0x81   : > { %v464_v8 = vadd.s32 384, %v461_v3  ;;  %v465_v9 = vadd.s32 512, %v461_v3  ;;  %v466_v10 = vadd.s32 640, %v461_v3  ;;  %v467_v11 = vadd.s32 768, %v461_v3  ;;  %v2963_v38 = vld [vmem:[%s2815_s5 + $0x128] sm:$0xff]  ;;  %p2488_p9 = scmp.ne.s32.totalorder %s3763_s27, %s2487_s25  ;;  %s2580_s29 = smov [#allocation11]  }
  0x82   : > { %v445_v12 = vadd.s32 %v2824_v1, %v427_v4  ;;  %v468_v13 = vadd.s32 896, %v461_v3  ;;  %v480_v14 = vmul.u32 2654435769, %v444_v5  ;;  %v641_v15 = vmul.u32 2246822507, %v461_v3  ;;  %s2491_s8 = sshll.u32 %s2580_s29, 4  ;;  %s2492_s8 = int_to_ptr.vmem [resolvable:$false] %s2491_s8 }
  0x83   : > { %v2832_v16 = vstv %s479_s6  ;;  %v642_v17 = vmul.u32 2246822507, %v462_v6  ;;  %v643_v18 = vmul.u32 2246822507, %v463_v7  ;;  %s649_s12 = sxor.u32 1597334677, %s479_s6  ;;  %p2489_p13 = pnand %p2488_p9, %p3938_p12 }
  0x84   : > { %v481_v19 = vmul.u32 2654435769, %v445_v12  ;;  %v497_v20 = vadd.s32 %v2832_v16, %v480_v14  ;;  %v644_v21 = vmul.u32 2246822507, %v464_v8  ;;  %v650_v24 = vstv %s649_s12  ;;  %v2861_v7 = vld [vmem:[%s2815_s5] sm:$0xff]  ;;  %s2493_s23 = scalar_lea.vmem %s2492_s8, 512  ;;  %p2494_p3 = scmp.lt.s32.totalorder %s3763_s27, %s2492_s8 }
  0x85   : > { %v645_v22 = vmul.u32 2246822507, %v465_v9  ;;  %v646_v23 = vmul.u32 2246822507, %v466_v10  ;;  %v651_v29 = vadd.s32 %v650_v24, %v641_v15  ;;  %v652_v30 = vadd.s32 %v650_v24, %v642_v17  ;;  %v2864_v8 = vld [vmem:[%s2815_s5 + $0x40] sm:$0xff]  ;;  %p2490_p6 = pneg %p2489_p13  ;;  %p2495_p1 = scmp.lt.s32.totalorder %s2493_s23, %s2487_s25 }
  0x86   : > { %v498_v25 = vadd.s32 %v2832_v16, %v481_v19  ;;  %v513_v26 = vshrl.u32 %v497_v20, 16  ;;  %v647_v27 = vmul.u32 2246822507, %v467_v11  ;;  %v648_v28 = vmul.u32 2246822507, %v468_v13  ;;  %v2868_v13 = vld [vmem:[%s2815_s5 + $0x20] sm:$0xff] }
  0x87   : > { %v653_v31 = vadd.s32 %v650_v24, %v643_v18  ;;  %v654_v32 = vadd.s32 %v650_v24, %v644_v21  ;;  %v655_v35 = vadd.s32 %v650_v24, %v645_v22  ;;  %v656_v36 = vadd.s32 %v650_v24, %v646_v23  ;;  %v2878_v19 = vld [vmem:[%s2815_s5 + $0x60] sm:$0xff]  ;;  %p2496_p10 = por %p2495_p1, %p2494_p3 }
  0x88   : > { %v514_v33 = vshrl.u32 %v498_v25, 16  ;;  %v529_v34 = vxor.u32 %v513_v26, %v497_v20  ;;  %v657_v39 = vadd.s32 %v650_v24, %v647_v27  ;;  %v658_v40 = vadd.s32 %v650_v24, %v648_v28 }
  0x89   : > { %v659_v41 = vshrl.u32 %v651_v29, 16  ;;  %v660_v42 = vshrl.u32 %v652_v30, 16  ;;  %v661_v45 = vshrl.u32 %v653_v31, 16  ;;  %v662_v46 = vshrl.u32 %v654_v32, 16  ;;  %p2497_p2 = pnand %p2496_p10, %p2490_p6 }
  0x8a   : > { %v530_v43 = vxor.u32 %v514_v33, %v498_v25  ;;  %v545_v44 = vmul.u32 2146121005, %v529_v34  ;;  %v663_v47 = vshrl.u32 %v655_v35, 16  ;;  %v664_v48 = vshrl.u32 %v656_v36, 16 }
  0x8b   : > { %v665_v49 = vshrl.u32 %v657_v39, 16  ;;  %v666_v50 = vshrl.u32 %v658_v40, 16  ;;  %v668_v53 = vxor.u32 %v660_v42, %v652_v30  ;;  %v667_v55 = vxor.u32 %v659_v41, %v651_v29  ;;  %v2900_v41 = vld [vmem:[%s2815_s5 + $0xe8] sm:$0xff] }
  0x8c   : > { %v546_v51 = vmul.u32 2146121005, %v530_v43  ;;  %v561_v52 = vshrl.u32 %v545_v44, 15  ;;  %v2844_v56 = vxor.u32 %v661_v45, %v653_v31  ;;  %v2846_v57 = vxor.u32 %v662_v46, %v654_v32  ;;  %v2889_v31 = vld [vmem:[%s2815_s5 + $0x88] sm:$0xff]  ;;  %v2908_v46 = vld [vmem:[%s2815_s5 + $0x80] sm:$0xff] }
  0x8d   : > { %v2848_v58 = vxor.u32 %v665_v49, %v657_v39  ;;  %v2850_v61 = vxor.u32 %v666_v50, %v658_v40  ;;  %v676_v62 = vmul.u32 2146121005, %v668_v53  ;;  %v671_v3 = vxor.u32 %v663_v47, %v655_v35  ;;  %v2897_v40 = vld [vmem:[%s2815_s5 + $0xa8] sm:$0xff]  ;;  %v2911_v47 = vld [vmem:[%s2815_s5 + $0xc0] sm:$0xff] }
  0x8e   : > { %v562_v59 = vshrl.u32 %v546_v51, 15  ;;  %v577_v60 = vxor.u32 %v561_v52, %v545_v44  ;;  %v3831_v4 = vmul.u32 2146121005, %v2844_v56  ;;  %v672_v6 = vxor.u32 %v664_v48, %v656_v36  ;;  %v2893_v36 = vld [vmem:[%s2815_s5 + $0xc8] sm:$0xff] }
  0x8f   : > { %3871 = vst [vmem:[#allocation15_spill] sm:$0xff] %v2848_v58  ;;  %v3830_v11 = vmul.u32 2146121005, %v2848_v58  ;;  %v684_v12 = vshrl.u32 %v676_v62, 15  ;;  %v2210_v18 = vpack.c.bf16 %v2856_v0, %v2853_v63  ;;  %v2117_v23 = vpack.c.bf16 %v2864_v8, %v2861_v7  ;;  %v2983_v63 = vld [vmem:[%s2815_s5 + $0x160] sm:$0xff]  ;;  %v414_v0 = vld [vmem:[#allocation5 + $0x28] sm:$0xff] }
  0x90   : > { %v578_v9 = vxor.u32 %v562_v59, %v546_v51  ;;  %v593_v10 = vmul.u32 2221713035, %v577_v60  ;;  %v2873_v15 = vshrl.u32 %v3831_v4, 15  ;;  %v680_v17 = vmul.u32 2146121005, %v672_v6  ;;  %1705 = vmatprep.mubr.f32.mxu0 %v414_v0 }
  0x91   : > { %v692_v22 = vxor.u32 %v684_v12, %v676_v62  ;;  %v2884_v24 = vshrl.u32 %v3830_v11, 15  ;;  %v675_v26 = vmul.u32 2146121005, %v667_v55  ;;  %v679_v27 = vmul.u32 2146121005, %v671_v3 }
  0x92   : > { %3872 = vst [vmem:[#allocation16_spill] sm:$0xff] %v2873_v15  ;;  %v594_v20 = vmul.u32 2221713035, %v578_v9  ;;  %v609_v21 = vshrl.u32 %v593_v10, 16  ;;  %v688_v25 = vshrl.u32 %v680_v17, 15  ;;  %v2213_v30 = vpack.c.bf16 %v2878_v19, %v2868_v13  ;;  %v3016_v19 = vld [vmem:[%s2815_s5 + $0x180] sm:$0xff] }
  0x93   : > { %3873 = vst [vmem:[#allocation17_spill] sm:$0xff] %v2884_v24  ;;  %v700_v29 = vmul.u32 2221713035, %v692_v22  ;;  %v428_v32 = vadd.s32 16, %v2826_v2  ;;  %v683_v34 = vshrl.u32 %v675_v26, 15  ;;  %v687_v35 = vshrl.u32 %v679_v27, 15 }
  0x94   : > { %v610_v28 = vshrl.u32 %v594_v20, 16  ;;  %v696_v33 = vxor.u32 %v688_v25, %v680_v17  ;;  %v429_v39 = vadd.s32 24, %v2826_v2  ;;  %v2902_v42 = vxor.u32 %v609_v21, %v593_v10 }
  0x95   : > { %v708_v44 = vshrl.u32 %v700_v29, 16  ;;  %v446_v45 = vadd.s32 %v2824_v1, %v428_v32  ;;  %v691_v49 = vxor.u32 %v683_v34, %v675_v26  ;;  %v695_v50 = vxor.u32 %v687_v35, %v679_v27 }
  0x96   : > { %3874 = vst [vmem:[#allocation18_spill] sm:$0xff] %v2902_v42  ;;  %v2904_v43 = vxor.u32 %v610_v28, %v594_v20  ;;  %v704_v48 = vmul.u32 2221713035, %v696_v33  ;;  %v447_v51 = vadd.s32 %v2824_v1, %v429_v39  ;;  %v430_v25 = vadd.s32 32, %v2826_v2 }
  0x97   : > { %v2914_v52 = vxor.u32 %v708_v44, %v700_v29  ;;  %v482_v53 = vmul.u32 2654435769, %v446_v45  ;;  %v699_v62 = vmul.u32 2221713035, %v691_v49  ;;  %v433_v13 = vadd.s32 56, %v2826_v2 }
  0x98   : > { %3875 = vst [vmem:[#allocation19_spill] sm:$0xff] %v2904_v43  ;;  %v712_v60 = vshrl.u32 %v704_v48, 16  ;;  %v703_v3 = vmul.u32 2221713035, %v695_v50  ;;  %v483_v12 = vmul.u32 2654435769, %v447_v51 }
  0x99   : > { %v724_v9 = vxor.u32 %v2914_v52, %v2902_v42  ;;  %v732_v10 = vxor.u32 %v2914_v52, %v2904_v43  ;;  %v499_v17 = vadd.s32 %v2832_v16, %v482_v53  ;;  %v707_v21 = vshrl.u32 %v699_v62, 16 }
  0x9a   : > { %v2927_v20 = vxor.u32 %v712_v60, %v704_v48  ;;  %v711_v22 = vshrl.u32 %v703_v3, 16  ;;  %v500_v28 = vadd.s32 %v2832_v16, %v483_v12  ;;  %v451_v0 = vadd.s32 %v2824_v1, %v433_v13 }
  0x9b   : > { %v852_v26 = vmul.u32 3266489909, %v724_v9  ;;  %v860_v27 = vmul.u32 3266489909, %v732_v10  ;;  %v515_v29 = vshrl.u32 %v499_v17, 16  ;;  %v2935_v34 = vxor.u32 %v707_v21, %v699_v62 }
  0x9c   : > { %v728_v32 = vxor.u32 %v2927_v20, %v2902_v42  ;;  %v736_v33 = vxor.u32 %v2927_v20, %v2904_v43  ;;  %v2937_v35 = vxor.u32 %v711_v22, %v703_v3  ;;  %v516_v45 = vshrl.u32 %v500_v28, 16 }
  0x9d   : > { %v980_v39 = vshrl.u32 %v852_v26, 16  ;;  %v988_v44 = vshrl.u32 %v860_v27, 16  ;;  %v531_v48 = vxor.u32 %v515_v29, %v499_v17  ;;  %v723_v51 = vxor.u32 %v2935_v34, %v2902_v42 }
  0x9e   : > { %v856_v49 = vmul.u32 3266489909, %v728_v32  ;;  %v864_v50 = vmul.u32 3266489909, %v736_v33  ;;  %v731_v53 = vxor.u32 %v2935_v34, %v2904_v43  ;;  %v727_v62 = vxor.u32 %v2937_v35, %v2902_v42 }
  0x9f   : > { %v1108_v60 = vxor.u32 %v980_v39, %v852_v26  ;;  %v1116_v9 = vxor.u32 %v988_v44, %v860_v27  ;;  %v735_v3 = vxor.u32 %v2937_v35, %v2904_v43  ;;  %v851_v21 = vmul.u32 3266489909, %v723_v51 }
  0xa0   : > { %v984_v10 = vshrl.u32 %v856_v49, 16  ;;  %v992_v12 = vshrl.u32 %v864_v50, 16  ;;  %v859_v17 = vmul.u32 3266489909, %v731_v53  ;;  %v855_v22 = vmul.u32 3266489909, %v727_v62 }
  0xa1   : > { %vm1236_vm0 = vcmp.ge.u32.totalorder %v1108_v60, 2147483648  ;;  %vm1244_vm1 = vcmp.ge.u32.totalorder %v1116_v9, 2147483648  ;;  %v863_v29 = vmul.u32 3266489909, %v735_v3  ;;  %v979_v32 = vshrl.u32 %v851_v21, 16  ;;  %v2951_v60 = vld [vmem:[%s2815_s5 + $0xa0] sm:$0xff] }
  0xa2   : > { %vm2115_vm2 = vmpackc.low %vm1244_vm1, %vm1236_vm0  ;;  %v1112_v26 = vxor.u32 %v984_v10, %v856_v49  ;;  %v1120_v27 = vxor.u32 %v992_v12, %v864_v50  ;;  %v987_v33 = vshrl.u32 %v859_v17, 16  ;;  %v983_v39 = vshrl.u32 %v855_v22, 16  ;;  %v2954_v9 = vld [vmem:[%s2815_s5 + $0xe0] sm:$0xff]  ;;  %v2957_v62 = vld [vmem:[%s2815_s5 + $0x108] sm:$0xff] }
  0xa3   : > { %2116 = vmatprep.subr.msk.bf16.mxu1 %vm2115_vm2, %v2114_v54  ;;  %v991_v44 = vshrl.u32 %v863_v29, 16  ;;  %v532_v51 = vxor.u32 %v516_v45, %v500_v28  ;;  %v547_v53 = vmul.u32 2146121005, %v531_v48  ;;  %v1107_v49 = vxor.u32 %v979_v32, %v851_v21  ;;  %v2966_v3 = vld [vmem:[%s2815_s5 + $0x168] sm:$0xff]  ;;  %v2969_v10 = vld [vmem:[%s2815_s5 + $0x100] sm:$0xff] }
  0xa4   : > { %vm1240_vm3 = vcmp.ge.u32.totalorder %v1112_v26, 2147483648  ;;  %vm1248_vm4 = vcmp.ge.u32.totalorder %v1120_v27, 2147483648  ;;  %v1115_v50 = vxor.u32 %v987_v33, %v859_v17  ;;  %v1111_v54 = vxor.u32 %v983_v39, %v855_v22  ;;  %v2977_v17 = vld [vmem:[%s2815_s5 + $0x140] sm:$0xff]  ;;  %v2994_v39 = vld [vmem:[%s2815_s5 + $0x188] sm:$0xff] }
  0xa5   : > { %vm2211_vm5 = vmpackc.low %vm1248_vm4, %vm1240_vm3  ;;  %v1119_v28 = vxor.u32 %v991_v44, %v863_v29  ;;  %v548_v45 = vmul.u32 2146121005, %v532_v51  ;;  %v563_v48 = vshrl.u32 %v547_v53, 15  ;;  %vm1235_vm6 = vcmp.ge.u32.totalorder %v1107_v49, 2147483648  ;;  %v2980_v22 = vld [vmem:[%s2815_s5 + $0x120] sm:$0xff]  ;;  %v410_v29 = vld [vmem:[#allocation5 + $0x8] sm:$0xff] }
  0xa6   : > { %2212 = vmatprep.subr.msk.bf16.mxu0 %vm2211_vm5, %v2210_v18  ;;  %vm1243_vm7 = vcmp.ge.u32.totalorder %v1115_v50, 2147483648  ;;  %v431_v12 = vadd.s32 40, %v2826_v2  ;;  %v448_v21 = vadd.s32 %v2824_v1, %v430_v25  ;;  %vm1239_vm9 = vcmp.ge.u32.totalorder %v1111_v54, 2147483648  ;;  %1555 = vmatprep.mubr.f32.mxu1 %v410_v29  ;;  %v2997_v44 = vld [vmem:[%s2815_s5 + $0x1c8] sm:$0xff] }
  0xa7   : > { %vm2118_vm8 = vmpackc.low %vm1243_vm7, %vm1235_vm6  ;;  %vm1247_vm10 = vcmp.ge.u32.totalorder %v1119_v28, 2147483648  ;;  %v564_v26 = vshrl.u32 %v548_v45, 15  ;;  %v579_v27 = vxor.u32 %v563_v48, %v547_v53  ;;  %v3007_v53 = vld [vmem:[%s2815_s5 + $0x1a8] sm:$0xff]  ;;  %v432_v28 = vadd.s32 48, %v2826_v2 }
  0xa8   : > { %2119 = vmatpush1.bf16.xpose.msk.msra.mxu1 %vm2118_vm8, %v2117_v23  ;;  %vm2214_vm11 = vmpackc.low %vm1247_vm10, %vm1239_vm9  ;;  %v449_v25 = vadd.s32 %v2824_v1, %v431_v12  ;;  %v484_v32 = vmul.u32 2654435769, %v448_v21  ;;  %v3010_v49 = vld [vmem:[%s2815_s5 + $0x1e8] sm:$0xff]  ;;  %v487_v21 = vmul.u32 2654435769, %v451_v0 }
  0xa9   : > { %2215 = vmatpush1.bf16.xpose.msk.msra.mxu0 %vm2214_vm11, %v2213_v30  ;;  %v580_v7 = vxor.u32 %v564_v26, %v548_v45  ;;  %v595_v8 = vmul.u32 2221713035, %v579_v27  ;;  %v3019_v30 = vld [vmem:[%s2815_s5 + $0x1c0] sm:$0xff]  ;;  %v450_v27 = vadd.s32 %v2824_v1, %v432_v28 }
  0xaa   : > { %v485_v50 = vmul.u32 2654435769, %v449_v25  ;;  %v501_v54 = vadd.s32 %v2832_v16, %v484_v32 }
  0xab   : > { %v596_v45 = vmul.u32 2221713035, %v580_v7  ;;  %v611_v48 = vshrl.u32 %v595_v8, 16  ;;  %v486_v5 = vmul.u32 2654435769, %v450_v27 }
  0xac   : > { %v502_v29 = vadd.s32 %v2832_v16, %v485_v50  ;;  %v517_v26 = vshrl.u32 %v501_v54, 16 }
  0xad   : > { %v612_v25 = vshrl.u32 %v596_v45, 16  ;;  %v3028_v32 = vxor.u32 %v611_v48, %v595_v8 }
  0xae   : > { %v518_v4 = vshrl.u32 %v502_v29, 16  ;;  %v533_v14 = vxor.u32 %v517_v26, %v501_v54  ;;  %v503_v54 = vadd.s32 %v2832_v16, %v486_v5 }
  0xaf   : > { %3876 = vst [vmem:[#allocation20_spill] sm:$0xff] %v3028_v32  ;;  %v3034_v12 = vxor.u32 %v612_v25, %v596_v45  ;;  %v740_v50 = vxor.u32 %v2914_v52, %v3028_v32  ;;  %v744_v28 = vxor.u32 %v2927_v20, %v3028_v32  ;;  %v739_v8 = vxor.u32 %v2935_v34, %v3028_v32 }
  0xb0   : > { %v743_v13 = vxor.u32 %v2937_v35, %v3028_v32  ;;  %v3044_v48 = vxor.u32 %v518_v4, %v502_v29  ;;  %v549_v11 = vmul.u32 2146121005, %v533_v14 }
  0xb1   : > { %3877 = vst [vmem:[#allocation21_spill] sm:$0xff] %v3034_v12  ;;  %v748_v45 = vxor.u32 %v2914_v52, %v3034_v12  ;;  %v868_v26 = vmul.u32 3266489909, %v740_v50  ;;  %v752_v27 = vxor.u32 %v2927_v20, %v3034_v12  ;;  %v872_v0 = vmul.u32 3266489909, %v744_v28 }
  0xb2   : > { %v747_v25 = vxor.u32 %v2935_v34, %v3034_v12  ;;  %v867_v7 = vmul.u32 3266489909, %v739_v8  ;;  %v751_v51 = vxor.u32 %v2937_v35, %v3034_v12  ;;  %v871_v4 = vmul.u32 3266489909, %v743_v13 }
  0xb3   : > { %v876_v29 = vmul.u32 3266489909, %v748_v45  ;;  %v996_v14 = vshrl.u32 %v868_v26, 16  ;;  %v880_v23 = vmul.u32 3266489909, %v752_v27  ;;  %v1000_v5 = vshrl.u32 %v872_v0, 16 }
  0xb4   : > { %v875_v33 = vmul.u32 3266489909, %v747_v25  ;;  %v995_v18 = vshrl.u32 %v867_v7, 16  ;;  %v879_v6 = vmul.u32 3266489909, %v751_v51  ;;  %v999_v50 = vshrl.u32 %v871_v4, 16 }
  0xb5   : > { %v1004_v59 = vshrl.u32 %v876_v29, 16  ;;  %v1124_v55 = vxor.u32 %v996_v14, %v868_v26  ;;  %v1008_v28 = vshrl.u32 %v880_v23, 16  ;;  %v1128_v32 = vxor.u32 %v1000_v5, %v872_v0  ;;  %v3056_v26 = vld [vmem:[%s2815_s5 + $0x1a0] sm:$0xff]  ;;  %v3062_v0 = vld [vmem:[%s2815_s5 + $0x208] sm:$0xff] }
  0xb6   : > { %v1003_v8 = vshrl.u32 %v875_v33, 16  ;;  %v1123_v43 = vxor.u32 %v995_v18, %v867_v7  ;;  %v1007_v42 = vshrl.u32 %v879_v6, 16  ;;  %v1127_v12 = vxor.u32 %v999_v50, %v871_v4  ;;  %v3059_v25 = vld [vmem:[%s2815_s5 + $0x1e0] sm:$0xff]  ;;  %v3074_v7 = vld [vmem:[%s2815_s5 + $0x268] sm:$0xff] }
  0xb7   : > { %v1132_v13 = vxor.u32 %v1004_v59, %v876_v29  ;;  %vm1252_vm12 = vcmp.ge.u32.totalorder %v1124_v55, 2147483648  ;;  %v1136_v45 = vxor.u32 %v1008_v28, %v880_v23  ;;  %vm1256_vm13 = vcmp.ge.u32.totalorder %v1128_v32, 2147483648  ;;  %v3066_v23 = vld [vmem:[%s2815_s5 + $0x248] sm:$0xff]  ;;  %v3083_v5 = vld [vmem:[%s2815_s5 + $0x200] sm:$0xff] }
  0xb8   : > { %v1131_v27 = vxor.u32 %v1003_v8, %v875_v33  ;;  %vm1251_vm14 = vcmp.ge.u32.totalorder %v1123_v43, 2147483648  ;;  %v1135_v51 = vxor.u32 %v1007_v42, %v879_v6  ;;  %vm1255_vm15 = vcmp.ge.u32.totalorder %v1127_v12, 2147483648  ;;  %v3071_v33 = vld [vmem:[%s2815_s5 + $0x228] sm:$0xff] }
  0xb9   : > { %vm1260_vm0 = vcmp.ge.u32.totalorder %v1132_v13, 2147483648  ;;  %vm1264_vm1 = vcmp.ge.u32.totalorder %v1136_v45, 2147483648  ;;  %v550_v18 = vmul.u32 2146121005, %v3044_v48  ;;  %v565_v59 = vshrl.u32 %v549_v11, 15 }
  0xba   : > { %vm2121_vm2 = vmpackc.low %vm1260_vm0, %vm1252_vm12  ;;  %vm1259_vm3 = vcmp.ge.u32.totalorder %v1131_v27, 2147483648  ;;  %vm1263_vm4 = vcmp.ge.u32.totalorder %v1135_v51, 2147483648  ;;  %v504_v42 = vadd.s32 %v2832_v16, %v487_v21  ;;  %v519_v6 = vshrl.u32 %v503_v54, 16  ;;  %v3086_v21 = vld [vmem:[%s2815_s5 + $0x240] sm:$0xff] }
  0xbb   : > { %v3878_v4 = vpack.c.bf16 %v2893_v36, %v2889_v31  ;;  %vm2217_vm5 = vmpackc.low %vm1264_vm1, %vm1256_vm13  ;;  %v566_v48 = vshrl.u32 %v550_v18, 15  ;;  %v581_v29 = vxor.u32 %v565_v59, %v549_v11  ;;  %v434_v55 = vadd.s32 64, %v2826_v2 }
  0xbc   : > { %v435_v14 = vadd.s32 72, %v2826_v2  ;;  %v3879_v50 = vpack.c.bf16 %v2900_v41, %v2897_v40  ;;  %vm2124_vm6 = vmpackc.low %vm1259_vm3, %vm1251_vm14  ;;  %v520_v31 = vshrl.u32 %v504_v42, 16  ;;  %v535_v36 = vxor.u32 %v519_v6, %v503_v54 }
  0xbd   : > { %2122 = vmatprep.subr.msk.bf16.mxu1 %vm2121_vm2, %v3878_v4  ;;  %v3880_v28 = vpack.c.bf16 %v2911_v47, %v2908_v46  ;;  %vm2220_vm7 = vmpackc.low %vm1263_vm4, %vm1255_vm15  ;;  %v582_v40 = vxor.u32 %v566_v48, %v550_v18  ;;  %v597_v41 = vmul.u32 2221713035, %v581_v29  ;;  %v452_v43 = vadd.s32 %v2824_v1, %v434_v55 }
  0xbe   : > { %2218 = vmatprep.subr.msk.bf16.mxu0 %vm2217_vm5, %v3879_v50  ;;  %v453_v8 = vadd.s32 %v2824_v1, %v435_v14  ;;  %v3881_v54 = vpack.c.bf16 %v2954_v9, %v2951_v60  ;;  %v536_v13 = vxor.u32 %v520_v31, %v504_v42  ;;  %v551_v45 = vmul.u32 2146121005, %v535_v36 }
  0xbf   : > { %2125 = vmatpush1.bf16.xpose.msk.msra.mxu1 %vm2124_vm6, %v3880_v28  ;;  %v598_v47 = vmul.u32 2221713035, %v582_v40  ;;  %v613_v12 = vshrl.u32 %v597_v41, 16  ;;  %v488_v51 = vmul.u32 2654435769, %v452_v43  ;;  %v436_v18 = vadd.s32 80, %v2826_v2 }
  0xc0   : > { %2221 = vmatpush1.bf16.xpose.msk.msra.mxu0 %vm2220_vm7, %v3881_v54  ;;  %v552_v59 = vmul.u32 2146121005, %v536_v13  ;;  %v567_v6 = vshrl.u32 %v551_v45, 15  ;;  %v489_v4 = vmul.u32 2654435769, %v453_v8  ;;  %v437_v48 = vadd.s32 88, %v2826_v2 }
  0xc1   : > { %v614_v60 = vshrl.u32 %v598_v47, 16  ;;  %v3113_v9 = vxor.u32 %v613_v12, %v597_v41  ;;  %v505_v42 = vadd.s32 %v2832_v16, %v488_v51  ;;  %v3117_v29 = vadd.s32 %v2824_v1, %v436_v18 }
  0xc2   : > { %v568_v55 = vshrl.u32 %v552_v59, 15  ;;  %v583_v14 = vxor.u32 %v567_v6, %v551_v45  ;;  %v3120_v50 = vadd.s32 %v2832_v16, %v489_v4  ;;  %v3123_v31 = vadd.s32 %v2824_v1, %v437_v48 }
  0xc3   : > { %3882 = vst [vmem:[#allocation22_spill] sm:$0xff] %v3113_v9  ;;  %v3125_v36 = vxor.u32 %v614_v60, %v598_v47  ;;  %v756_v28 = vxor.u32 %v2914_v52, %v3113_v9  ;;  %v760_v40 = vxor.u32 %v2927_v20, %v3113_v9  ;;  %v755_v41 = vxor.u32 %v2935_v34, %v3113_v9 }
  0xc4   : > { %v759_v43 = vxor.u32 %v2937_v35, %v3113_v9  ;;  %v3135_v8 = vxor.u32 %v568_v55, %v552_v59  ;;  %v599_v54 = vmul.u32 2221713035, %v583_v14  ;;  %v521_v13 = vshrl.u32 %v505_v42, 16 }
  0xc5   : > { %3883 = vst [vmem:[#allocation23_spill] sm:$0xff] %v3125_v36  ;;  %v764_v45 = vxor.u32 %v2914_v52, %v3125_v36  ;;  %v884_v47 = vmul.u32 3266489909, %v756_v28  ;;  %v768_v12 = vxor.u32 %v2927_v20, %v3125_v36  ;;  %v888_v51 = vmul.u32 3266489909, %v760_v40 }
  0xc6   : > { %v763_v18 = vxor.u32 %v2935_v34, %v3125_v36  ;;  %v883_v6 = vmul.u32 3266489909, %v755_v41  ;;  %v767_v4 = vxor.u32 %v2937_v35, %v3125_v36  ;;  %v887_v48 = vmul.u32 3266489909, %v759_v43 }
  0xc7   : > { %v892_v59 = vmul.u32 3266489909, %v764_v45  ;;  %v1012_v60 = vshrl.u32 %v884_v47, 16  ;;  %v896_v55 = vmul.u32 3266489909, %v768_v12  ;;  %v1016_v14 = vshrl.u32 %v888_v51, 16 }
  0xc8   : > { %v891_v46 = vmul.u32 3266489909, %v763_v18  ;;  %v1011_v27 = vshrl.u32 %v883_v6, 16  ;;  %v895_v32 = vmul.u32 3266489909, %v767_v4  ;;  %v1015_v28 = vshrl.u32 %v887_v48, 16 }
  0xc9   : > { %v1020_v11 = vshrl.u32 %v892_v59, 16  ;;  %v1140_v9 = vxor.u32 %v1012_v60, %v884_v47  ;;  %v1024_v40 = vshrl.u32 %v896_v55, 16  ;;  %v1144_v24 = vxor.u32 %v1016_v14, %v888_v51  ;;  %v3146_v4 = vld [vmem:[%s2815_s5 + $0x220] sm:$0xff]  ;;  %v3152_v60 = vld [vmem:[%s2815_s5 + $0x288] sm:$0xff] }
  0xca   : > { %v1019_v41 = vshrl.u32 %v891_v46, 16  ;;  %v1139_v58 = vxor.u32 %v1011_v27, %v883_v6  ;;  %v1023_v15 = vshrl.u32 %v895_v32, 16  ;;  %v1143_v36 = vxor.u32 %v1015_v28, %v887_v48  ;;  %v3149_v47 = vld [vmem:[%s2815_s5 + $0x260] sm:$0xff]  ;;  %v3156_v6 = vld [vmem:[%s2815_s5 + $0x2c8] sm:$0xff] }
  0xcb   : > { %v1148_v43 = vxor.u32 %v1020_v11, %v892_v59  ;;  %vm1268_vm8 = vcmp.ge.u32.totalorder %v1140_v9, 2147483648  ;;  %v1152_v45 = vxor.u32 %v1024_v40, %v896_v55  ;;  %vm1272_vm9 = vcmp.ge.u32.totalorder %v1144_v24, 2147483648 }
  0xcc   : > { %v1147_v12 = vxor.u32 %v1019_v41, %v891_v46  ;;  %vm1267_vm10 = vcmp.ge.u32.totalorder %v1139_v58, 2147483648  ;;  %v1151_v18 = vxor.u32 %v1023_v15, %v895_v32  ;;  %vm1271_vm11 = vcmp.ge.u32.totalorder %v1143_v36, 2147483648 }
  0xcd   : > { %vm1276_vm12 = vcmp.ge.u32.totalorder %v1148_v43, 2147483648  ;;  %vm1280_vm13 = vcmp.ge.u32.totalorder %v1152_v45, 2147483648  ;;  %v600_v27 = vmul.u32 2221713035, %v3135_v8  ;;  %v615_v51 = vshrl.u32 %v599_v54, 16 }
  0xce   : > { %vm2127_vm14 = vmpackc.low %vm1276_vm12, %vm1268_vm8  ;;  %vm1275_vm15 = vcmp.ge.u32.totalorder %v1147_v12, 2147483648  ;;  %vm1279_vm0 = vcmp.ge.u32.totalorder %v1151_v18, 2147483648  ;;  %v522_v15 = vshrl.u32 %v3120_v50, 16  ;;  %v3160_v11 = vxor.u32 %v521_v13, %v505_v42 }
  0xcf   : > { %v3884_v32 = vpack.c.bf16 %v2960_v37, %v2957_v62  ;;  %vm2223_vm1 = vmpackc.low %vm1280_vm13, %vm1272_vm9  ;;  %v616_v46 = vshrl.u32 %v600_v27, 16  ;;  %v3166_v48 = vxor.u32 %v615_v51, %v599_v54  ;;  %v490_v9 = vmul.u32 2654435769, %v3117_v29 }
  0xd0   : > { %v3885_v59 = vpack.c.bf16 %v2966_v3, %v2963_v38  ;;  %vm2130_vm2 = vmpackc.low %vm1275_vm15, %vm1267_vm10  ;;  %v3176_v42 = vxor.u32 %v522_v15, %v3120_v50  ;;  %v553_v24 = vmul.u32 2146121005, %v3160_v11  ;;  %v491_v62 = vmul.u32 2654435769, %v3123_v31 }
  0xd1   : > { %2128 = vmatprep.subr.msk.bf16.mxu1 %vm2127_vm14, %v3884_v32  ;;  %v3886_v54 = vpack.c.bf16 %v2977_v17, %v2969_v10  ;;  %vm2226_vm3 = vmpackc.low %vm1279_vm0, %vm1271_vm11  ;;  %v3187_v38 = vxor.u32 %v616_v46, %v600_v27  ;;  %v772_v58 = vxor.u32 %v2914_v52, %v3166_v48  ;;  %v776_v3 = vxor.u32 %v2927_v20, %v3166_v48 }
  0xd2   : > { %2224 = vmatprep.subr.msk.bf16.mxu0 %vm2223_vm1, %v3885_v59  ;;  %v771_v29 = vxor.u32 %v2935_v34, %v3166_v48  ;;  %v3888_v50 = vpack.c.bf16 %v2983_v63, %v2980_v22  ;;  %v775_v10 = vxor.u32 %v2937_v35, %v3166_v48  ;;  %v554_v17 = vmul.u32 2146121005, %v3176_v42 }
  0xd3   : > { %2131 = vmatpush1.bf16.xpose.msk.msra.mxu1 %vm2130_vm2, %v3886_v54  ;;  %3887 = vst [vmem:[#allocation24_spill] sm:$0xff] %v3187_v38  ;;  %v569_v31 = vshrl.u32 %v553_v24, 15  ;;  %v507_v36 = vadd.s32 %v2832_v16, %v490_v9  ;;  %v780_v13 = vxor.u32 %v2914_v52, %v3187_v38  ;;  %v900_v55 = vmul.u32 3266489909, %v772_v58 }
  0xd4   : > { %2227 = vmatpush1.bf16.xpose.msk.msra.mxu0 %vm2226_vm3, %v3888_v50  ;;  %v784_v14 = vxor.u32 %v2927_v20, %v3187_v38  ;;  %v904_v28 = vmul.u32 3266489909, %v776_v3  ;;  %v779_v22 = vxor.u32 %v2935_v34, %v3187_v38  ;;  %v899_v63 = vmul.u32 3266489909, %v771_v29 }
  0xd5   : > { %v783_v40 = vxor.u32 %v2937_v35, %v3187_v38  ;;  %v903_v41 = vmul.u32 3266489909, %v775_v10  ;;  %v908_v43 = vmul.u32 3266489909, %v780_v13  ;;  %v1028_v45 = vshrl.u32 %v900_v55, 16  ;;  %v3211_v10 = vld [vmem:[%s2815_s5 + $0x2a8] sm:$0xff] }
  0xd6   : > { %v912_v12 = vmul.u32 3266489909, %v784_v14  ;;  %v1032_v18 = vshrl.u32 %v904_v28, 16  ;;  %v907_v27 = vmul.u32 3266489909, %v779_v22  ;;  %v1027_v51 = vshrl.u32 %v899_v63, 16 }
  0xd7   : > { %v911_v15 = vmul.u32 3266489909, %v783_v40  ;;  %v1031_v11 = vshrl.u32 %v903_v41, 16  ;;  %v1036_v32 = vshrl.u32 %v908_v43, 16  ;;  %v1156_v46 = vxor.u32 %v1028_v45, %v900_v55  ;;  %v3214_v14 = vld [vmem:[%s2815_s5 + $0x2e8] sm:$0xff]  ;;  %v3220_v22 = vld [vmem:[%s2815_s5 + $0x2c0] sm:$0xff] }
  0xd8   : > { %v1040_v9 = vshrl.u32 %v912_v12, 16  ;;  %v1160_v59 = vxor.u32 %v1032_v18, %v904_v28  ;;  %v1035_v42 = vshrl.u32 %v907_v27, 16  ;;  %v1155_v54 = vxor.u32 %v1027_v51, %v899_v63  ;;  %v3217_v28 = vld [vmem:[%s2815_s5 + $0x280] sm:$0xff]  ;;  %v3231_v18 = vld [vmem:[%s2815_s5 + $0x308] sm:$0xff] }
  0xd9   : > { %v1039_v58 = vshrl.u32 %v911_v15, 16  ;;  %v1159_v3 = vxor.u32 %v1031_v11, %v903_v41  ;;  %v1164_v29 = vxor.u32 %v1036_v32, %v908_v43  ;;  %vm1284_vm4 = vcmp.ge.u32.totalorder %v1156_v46, 2147483648  ;;  %v3223_v41 = vld [vmem:[%s2815_s5 + $0x2a0] sm:$0xff]  ;;  %v3245_v11 = vld [vmem:[%s2815_s5 + $0x328] sm:$0xff] }
  0xda   : > { %v1168_v50 = vxor.u32 %v1040_v9, %v912_v12  ;;  %vm1288_vm5 = vcmp.ge.u32.totalorder %v1160_v59, 2147483648  ;;  %v1163_v13 = vxor.u32 %v1035_v42, %v907_v27  ;;  %vm1283_vm6 = vcmp.ge.u32.totalorder %v1155_v54, 2147483648  ;;  %v3226_v43 = vld [vmem:[%s2815_s5 + $0x2e0] sm:$0xff]  ;;  %v3234_v27 = vld [vmem:[%s2815_s5 + $0x348] sm:$0xff] }
  0xdb   : > { %v1167_v55 = vxor.u32 %v1039_v58, %v911_v15  ;;  %vm1287_vm7 = vcmp.ge.u32.totalorder %v1159_v3, 2147483648  ;;  %vm1292_vm8 = vcmp.ge.u32.totalorder %v1164_v29, 2147483648  ;;  %v570_v63 = vshrl.u32 %v554_v17, 15  ;;  %v3248_v32 = vld [vmem:[%s2815_s5 + $0x368] sm:$0xff]  ;;  %v3258_v59 = vld [vmem:[%s2815_s5 + $0x300] sm:$0xff] }
  0xdc   : > { %vm1296_vm9 = vcmp.ge.u32.totalorder %v1168_v50, 2147483648  ;;  %v585_v40 = vxor.u32 %v569_v31, %v553_v24  ;;  %vm2133_vm10 = vmpackc.low %vm1292_vm8, %vm1284_vm4  ;;  %vm1291_vm11 = vcmp.ge.u32.totalorder %v1163_v13, 2147483648  ;;  %v508_v45 = vadd.s32 %v2832_v16, %v491_v62  ;;  %v3261_v42 = vld [vmem:[%s2815_s5 + $0x340] sm:$0xff] }
  0xdd   : > { %vm1295_vm12 = vcmp.ge.u32.totalorder %v1167_v55, 2147483648  ;;  %v523_v12 = vshrl.u32 %v507_v36, 16  ;;  %v3889_v24 = vpack.c.bf16 %v2997_v44, %v2994_v39  ;;  %vm2229_vm13 = vmpackc.low %vm1296_vm9, %vm1288_vm5  ;;  %v586_v31 = vxor.u32 %v570_v63, %v554_v17 }
  0xde   : > { %v601_v51 = vmul.u32 2221713035, %v585_v40  ;;  %v3890_v46 = vpack.c.bf16 %v3010_v49, %v3007_v53  ;;  %vm2136_vm14 = vmpackc.low %vm1291_vm11, %vm1283_vm6  ;;  %v524_v39 = vshrl.u32 %v508_v45, 16  ;;  %v438_v17 = vadd.s32 96, %v2826_v2 }
  0xdf   : > { %2134 = vmatprep.subr.msk.bf16.mxu1 %vm2133_vm10, %v3889_v24  ;;  %v539_v44 = vxor.u32 %v523_v12, %v507_v36  ;;  %v439_v9 = vadd.s32 104, %v2826_v2  ;;  %v3891_v58 = vpack.c.bf16 %v3019_v30, %v3016_v19  ;;  %vm2232_vm15 = vmpackc.low %vm1295_vm12, %vm1287_vm7  ;;  %v602_v53 = vmul.u32 2221713035, %v586_v31 }
  0xe0   : > { %2230 = vmatprep.subr.msk.bf16.mxu0 %vm2229_vm13, %v3890_v46  ;;  %v617_v49 = vshrl.u32 %v601_v51, 16  ;;  %v3892_v29 = vpack.c.bf16 %v3059_v25, %v3056_v26  ;;  %v540_v50 = vxor.u32 %v524_v39, %v508_v45  ;;  %v456_v19 = vadd.s32 %v2824_v1, %v438_v17 }
  0xe1   : > { %2137 = vmatpush1.bf16.xpose.msk.msra.mxu1 %vm2136_vm14, %v3891_v58  ;;  %v555_v13 = vmul.u32 2146121005, %v539_v44  ;;  %v457_v30 = vadd.s32 %v2824_v1, %v439_v9  ;;  %v618_v3 = vshrl.u32 %v602_v53, 16  ;;  %v440_v26 = vadd.s32 112, %v2826_v2 }
  0xe2   : > { %2233 = vmatpush1.bf16.xpose.msk.msra.mxu0 %vm2232_vm15, %v3892_v29  ;;  %v3277_v55 = vxor.u32 %v617_v49, %v601_v51  ;;  %v556_v12 = vmul.u32 2146121005, %v540_v50  ;;  %v492_v31 = vmul.u32 2654435769, %v456_v19 }
  0xe3   : > { %v571_v24 = vshrl.u32 %v555_v13, 15  ;;  %v3284_v25 = vxor.u32 %v618_v3, %v602_v53  ;;  %v493_v9 = vmul.u32 2654435769, %v457_v30 }
  0xe4   : > { %3893 = vst [vmem:[#allocation25_spill] sm:$0xff] %v3277_v55  ;;  %v788_v45 = vxor.u32 %v2914_v52, %v3277_v55  ;;  %v792_v51 = vxor.u32 %v2927_v20, %v3277_v55  ;;  %v787_v46 = vxor.u32 %v2935_v34, %v3277_v55  ;;  %v791_v39 = vxor.u32 %v2937_v35, %v3277_v55 }
  0xe5   : > { %3894 = vst [vmem:[#allocation26_spill] sm:$0xff] %v3284_v25  ;;  %v572_v44 = vshrl.u32 %v556_v12, 15  ;;  %v3294_v17 = vxor.u32 %v571_v24, %v555_v13  ;;  %v796_v58 = vxor.u32 %v2914_v52, %v3284_v25  ;;  %v800_v49 = vxor.u32 %v2927_v20, %v3284_v25 }
  0xe6   : > { %v916_v53 = vmul.u32 3266489909, %v788_v45  ;;  %v920_v29 = vmul.u32 3266489909, %v792_v51  ;;  %v795_v50 = vxor.u32 %v2935_v34, %v3284_v25  ;;  %v799_v3 = vxor.u32 %v2937_v35, %v3284_v25 }
  0xe7   : > { %v915_v19 = vmul.u32 3266489909, %v787_v46  ;;  %v919_v40 = vmul.u32 3266489909, %v791_v39 }
  0xe8   : > { %v924_v63 = vmul.u32 3266489909, %v796_v58  ;;  %v1044_v13 = vshrl.u32 %v916_v53, 16  ;;  %v928_v24 = vmul.u32 3266489909, %v800_v49  ;;  %v1048_v30 = vshrl.u32 %v920_v29, 16 }
  0xe9   : > { %v923_v54 = vmul.u32 3266489909, %v795_v50  ;;  %v1043_v36 = vshrl.u32 %v915_v19, 16  ;;  %v927_v62 = vmul.u32 3266489909, %v799_v3  ;;  %v1047_v45 = vshrl.u32 %v919_v40, 16 }
  0xea   : > { %v1052_v15 = vshrl.u32 %v924_v63, 16  ;;  %v1172_v37 = vxor.u32 %v1044_v13, %v916_v53  ;;  %v1056_v51 = vshrl.u32 %v928_v24, 16  ;;  %v1176_v8 = vxor.u32 %v1048_v30, %v920_v29  ;;  %v3305_v53 = vld [vmem:[%s2815_s5 + $0x320] sm:$0xff] }
  0xeb   : > { %v1051_v55 = vshrl.u32 %v923_v54, 16  ;;  %v1171_v46 = vxor.u32 %v1043_v36, %v915_v19  ;;  %v1055_v38 = vshrl.u32 %v927_v62, 16  ;;  %v1175_v25 = vxor.u32 %v1047_v45, %v919_v40  ;;  %v3308_v3 = vld [vmem:[%s2815_s5 + $0x360] sm:$0xff] }
  0xec   : > { %v1180_v39 = vxor.u32 %v1052_v15, %v924_v63  ;;  %vm1300_vm0 = vcmp.ge.u32.totalorder %v1172_v37, 2147483648  ;;  %v1184_v58 = vxor.u32 %v1056_v51, %v928_v24  ;;  %vm1304_vm1 = vcmp.ge.u32.totalorder %v1176_v8, 2147483648  ;;  %v3312_v15 = vld [vmem:[%s2815_s5 + $0x388] sm:$0xff]  ;;  %v3333_v19 = vld [vmem:[%s2815_s5 + $0x380] sm:$0xff] }
  0xed   : > { %v1179_v49 = vxor.u32 %v1051_v55, %v923_v54  ;;  %vm1299_vm2 = vcmp.ge.u32.totalorder %v1171_v46, 2147483648  ;;  %v1183_v50 = vxor.u32 %v1055_v38, %v927_v62  ;;  %vm1303_vm3 = vcmp.ge.u32.totalorder %v1175_v25, 2147483648  ;;  %v3315_v63 = vld [vmem:[%s2815_s5 + $0x3c8] sm:$0xff] }
  0xee   : > { %vm1308_vm4 = vcmp.ge.u32.totalorder %v1180_v39, 2147483648  ;;  %vm1312_vm5 = vcmp.ge.u32.totalorder %v1184_v58, 2147483648  ;;  %v588_v36 = vxor.u32 %v572_v44, %v556_v12  ;;  %v603_v40 = vmul.u32 2221713035, %v3294_v17  ;;  %v3321_v54 = vld [vmem:[%s2815_s5 + $0x3a8] sm:$0xff] }
  0xef   : > { %vm2139_vm6 = vmpackc.low %vm1308_vm4, %vm1300_vm0  ;;  %vm1307_vm7 = vcmp.ge.u32.totalorder %v1179_v49, 2147483648  ;;  %vm1311_vm8 = vcmp.ge.u32.totalorder %v1183_v50, 2147483648  ;;  %v509_v38 = vadd.s32 %v2832_v16, %v492_v31  ;;  %v510_v62 = vadd.s32 %v2832_v16, %v493_v9  ;;  %v3324_v55 = vld [vmem:[%s2815_s5 + $0x3e8] sm:$0xff]  ;;  %v3336_v31 = vld [vmem:[%s2815_s5 + $0x3c0] sm:$0xff] }
  0xf0   : > { %v3895_v12 = vpack.c.bf16 %v3066_v23, %v3062_v0  ;;  %vm2235_vm9 = vmpackc.low %vm1312_vm5, %vm1304_vm1  ;;  %v604_v44 = vmul.u32 2221713035, %v588_v36  ;;  %v619_v17 = vshrl.u32 %v603_v40, 16  ;;  %v441_v37 = vadd.s32 120, %v2826_v2 }
  0xf1   : > { %v458_v29 = vadd.s32 %v2824_v1, %v440_v26  ;;  %v3896_v9 = vpack.c.bf16 %v3074_v7, %v3071_v33  ;;  %vm2142_vm10 = vmpackc.low %vm1307_vm7, %vm1299_vm2  ;;  %v525_v0 = vshrl.u32 %v509_v38, 16  ;;  %v526_v23 = vshrl.u32 %v510_v62, 16 }
  0xf2   : > { %2140 = vmatprep.subr.msk.bf16.mxu1 %vm2139_vm6, %v3895_v12  ;;  %v3897_v26 = vpack.c.bf16 %v3086_v21, %v3083_v5  ;;  %vm2238_vm11 = vmpackc.low %vm1311_vm8, %vm1303_vm3  ;;  %v620_v33 = vshrl.u32 %v604_v44, 16  ;;  %v3352_v7 = vxor.u32 %v619_v17, %v603_v40  ;;  %v3898_v30 = vpack.c.bf16 %v3149_v47, %v3146_v4 }
  0xf3   : > { %2236 = vmatprep.subr.msk.bf16.mxu0 %vm2235_vm9, %v3896_v9  ;;  %v494_v13 = vmul.u32 2654435769, %v458_v29  ;;  %v541_v45 = vxor.u32 %v525_v0, %v509_v38  ;;  %v542_v51 = vxor.u32 %v526_v23, %v510_v62  ;;  %v3360_v46 = vadd.s32 %v2824_v1, %v441_v37 }
  0xf4   : > { %2143 = vmatpush1.bf16.xpose.msk.msra.mxu1 %vm2142_vm10, %v3897_v26  ;;  %2239 = vmatpush1.bf16.xpose.msk.msra.mxu0 %vm2238_vm11, %v3898_v30  ;;  %v3364_v21 = vxor.u32 %v620_v33, %v604_v44  ;;  %v804_v25 = vxor.u32 %v2914_v52, %v3352_v7  ;;  %v808_v39 = vxor.u32 %v2927_v20, %v3352_v7 }
  0xf5   : > { %v803_v4 = vxor.u32 %v2935_v34, %v3352_v7  ;;  %v807_v47 = vxor.u32 %v2937_v35, %v3352_v7  ;;  %v557_v58 = vmul.u32 2146121005, %v541_v45  ;;  %v558_v1 = vmul.u32 2146121005, %v542_v51 }
  0xf6   : > { %v511_v49 = vadd.s32 %v2832_v16, %v494_v13  ;;  %v812_v50 = vxor.u32 %v2914_v52, %v3364_v21  ;;  %v932_v36 = vmul.u32 3266489909, %v804_v25  ;;  %v816_v40 = vxor.u32 %v2927_v20, %v3364_v21 }
  0xf7   : > { %v936_v38 = vmul.u32 3266489909, %v808_v39  ;;  %v811_v62 = vxor.u32 %v2935_v34, %v3364_v21  ;;  %v931_v12 = vmul.u32 3266489909, %v803_v4  ;;  %v815_v44 = vxor.u32 %v2937_v35, %v3364_v21 }
  0xf8   : > { %v935_v17 = vmul.u32 3266489909, %v807_v47  ;;  %v940_v37 = vmul.u32 3266489909, %v812_v50  ;;  %v1060_v29 = vshrl.u32 %v932_v36, 16 }
  0xf9   : > { %v944_v9 = vmul.u32 3266489909, %v816_v40  ;;  %v1064_v0 = vshrl.u32 %v936_v38, 16  ;;  %v939_v23 = vmul.u32 3266489909, %v811_v62  ;;  %v1059_v26 = vshrl.u32 %v931_v12, 16 }
  0xfa   : > { %v943_v33 = vmul.u32 3266489909, %v815_v44  ;;  %v1063_v13 = vshrl.u32 %v935_v17, 16  ;;  %v1068_v30 = vshrl.u32 %v940_v37, 16  ;;  %v1188_v45 = vxor.u32 %v1060_v29, %v932_v36  ;;  %v3384_v44 = vld [vmem:[%s2815_s5 + $0x3a0] sm:$0xff] }
  0xfb   : > { %v1072_v51 = vshrl.u32 %v944_v9, 16  ;;  %v1192_v25 = vxor.u32 %v1064_v0, %v936_v38  ;;  %v1067_v39 = vshrl.u32 %v939_v23, 16  ;;  %v1187_v4 = vxor.u32 %v1059_v26, %v931_v12  ;;  %v3387_v36 = vld [vmem:[%s2815_s5 + $0x3e0] sm:$0xff] }
  0xfc   : > { %v1071_v5 = vshrl.u32 %v943_v33, 16  ;;  %v1191_v24 = vxor.u32 %v1063_v13, %v935_v17  ;;  %v1196_v47 = vxor.u32 %v1068_v30, %v940_v37  ;;  %vm1316_vm12 = vcmp.ge.u32.totalorder %v1188_v45, 2147483648  ;;  %v3390_v17 = vld [vmem:[%s2815_s5 + $0x18] sm:$0xff] }
  0xfd   : > { %v1200_v50 = vxor.u32 %v1072_v51, %v944_v9  ;;  %vm1320_vm13 = vcmp.ge.u32.totalorder %v1192_v25, 2147483648  ;;  %v1195_v40 = vxor.u32 %v1067_v39, %v939_v23  ;;  %vm1315_vm14 = vcmp.ge.u32.totalorder %v1187_v4, 2147483648  ;;  %v3393_v37 = vld [vmem:[%s2815_s5 + $0x58] sm:$0xff] }
  0xfe   : > { %v1199_v62 = vxor.u32 %v1071_v5, %v943_v33  ;;  %vm1319_vm15 = vcmp.ge.u32.totalorder %v1191_v24, 2147483648  ;;  %vm1324_vm0 = vcmp.ge.u32.totalorder %v1196_v47, 2147483648  ;;  %v573_v38 = vshrl.u32 %v557_v58, 15  ;;  %v3406_v30 = vld [vmem:[%s2815_s5 + $0x38] sm:$0xff] }
  0xff   : > { %vm1328_vm1 = vcmp.ge.u32.totalorder %v1200_v50, 2147483648  ;;  %v574_v12 = vshrl.u32 %v558_v1, 15  ;;  %vm2145_vm2 = vmpackc.low %vm1324_vm0, %vm1316_vm12  ;;  %vm1323_vm3 = vcmp.ge.u32.totalorder %v1195_v40, 2147483648  ;;  %v495_v5 = vmul.u32 2654435769, %v3360_v46  ;;  %v3409_v46 = vld [vmem:[%s2815_s5 + $0x78] sm:$0xff] }
 0x100   : > { %vm1327_vm4 = vcmp.ge.u32.totalorder %v1199_v62, 2147483648  ;;  %v527_v29 = vshrl.u32 %v511_v49, 16  ;;  %v3899_v9 = vpack.c.bf16 %v3156_v6, %v3152_v60  ;;  %vm2241_vm5 = vmpackc.low %vm1328_vm1, %vm1320_vm13  ;;  %v589_v0 = vxor.u32 %v573_v38, %v557_v58  ;;  %v3906_v50 = vld [vmem:[#allocation16_spill] sm:$0xff] }
 0x101   : > { %v590_v23 = vxor.u32 %v574_v12, %v558_v1  ;;  %v3900_v33 = vmul.u32 2146121005, %v2846_v57  ;;  %v3901_v60 = vpack.c.bf16 %v3214_v14, %v3211_v10  ;;  %vm2148_vm6 = vmpackc.low %vm1323_vm3, %vm1315_vm14  ;;  %v512_v6 = vadd.s32 %v2832_v16, %v495_v5  ;;  %v3428_v16 = vld [vmem:[%s2815_s5 + $0x10] sm:$0xff] }
 0x102   : > { %2146 = vmatprep.subr.msk.bf16.mxu1 %vm2145_vm2, %v3899_v9  ;;  %v543_v58 = vxor.u32 %v527_v29, %v511_v49  ;;  %v3902_v45 = vmul.u32 2146121005, %v2850_v61  ;;  %v3903_v25 = vpack.c.bf16 %v3220_v22, %v3217_v28  ;;  %vm2244_vm7 = vmpackc.low %vm1327_vm4, %vm1319_vm15  ;;  %v605_v10 = vmul.u32 2221713035, %v589_v0  ;;  %v3431_v49 = vld [vmem:[%s2815_s5 + $0x50] sm:$0xff]  ;;  %v3911_v61 = vld [vmem:[#allocation15_spill] sm:$0xff] }
 0x103   : > { %v686_v13 = vshrl.u32 %v3900_v33, 15  ;;  %2242 = vmatprep.subr.msk.bf16.mxu0 %vm2241_vm5, %v3901_v60  ;;  %v606_v14 = vmul.u32 2221713035, %v590_v23  ;;  %v3904_v39 = vmov %v3900_v33  ;;  %v3905_v47 = vmul.u32 2146121005, %v2844_v56 }
 0x104   : > { %v690_v51 = vshrl.u32 %v3902_v45, 15  ;;  %2149 = vmatpush1.bf16.xpose.msk.msra.mxu1 %vm2148_vm6, %v3903_v25  ;;  %v3907_v28 = vpack.c.bf16 %v3226_v43, %v3223_v41  ;;  %v528_v22 = vshrl.u32 %v512_v6, 16  ;;  %v559_v24 = vmul.u32 2146121005, %v543_v58  ;;  %v3913_v58 = vld [vmem:[#allocation17_spill] sm:$0xff] }
 0x105   : > { %v694_v4 = vxor.u32 %v686_v13, %v3904_v39  ;;  %v693_v40 = vxor.u32 %v3906_v50, %v3905_v47  ;;  %v3908_v62 = vmov %v3902_v45  ;;  %v621_v12 = vshrl.u32 %v605_v10, 16 }
 0x106   : > { %2245 = vmatpush1.bf16.xpose.msk.msra.mxu0 %vm2244_vm7, %v3907_v28  ;;  %v698_v38 = vxor.u32 %v690_v51, %v3908_v62  ;;  %v622_v5 = vshrl.u32 %v606_v14, 16  ;;  %v544_v0 = vxor.u32 %v528_v22, %v512_v6  ;;  %v575_v56 = vshrl.u32 %v559_v24, 15 }
 0x107   : > { %v702_v29 = vmul.u32 2221713035, %v694_v4  ;;  %v701_v9 = vmul.u32 2221713035, %v693_v40  ;;  %v3445_v41 = vxor.u32 %v621_v12, %v605_v10 }
 0x108   : > { %v706_v23 = vmul.u32 2221713035, %v698_v38  ;;  %v3447_v43 = vxor.u32 %v622_v5, %v606_v14  ;;  %v3912_v60 = vmul.u32 2146121005, %v3911_v61  ;;  %v3454_v25 = vxor.u32 %v575_v56, %v559_v24 }
 0x109   : > { %3909 = vst [vmem:[#allocation16_spill] sm:$0xff] %v3445_v41  ;;  %v710_v13 = vshrl.u32 %v702_v29, 16  ;;  %v560_v51 = vmul.u32 2146121005, %v544_v0  ;;  %v709_v6 = vshrl.u32 %v701_v9, 16  ;;  %v820_v4 = vxor.u32 %v2914_v52, %v3445_v41 }
 0x10a   : > { %3910 = vst [vmem:[#allocation27_spill] sm:$0xff] %v3447_v43  ;;  %v3452_v45 = vxor.u32 %v3913_v58, %v3912_v60  ;;  %v714_v39 = vshrl.u32 %v706_v23, 16  ;;  %v828_v10 = vxor.u32 %v2914_v52, %v3447_v43  ;;  %v824_v14 = vxor.u32 %v2927_v20, %v3445_v41 }
 0x10b   : > { %v832_v47 = vxor.u32 %v2927_v20, %v3447_v43  ;;  %v819_v50 = vxor.u32 %v2935_v34, %v3445_v41  ;;  %v827_v40 = vxor.u32 %v2935_v34, %v3447_v43  ;;  %v823_v28 = vxor.u32 %v2937_v35, %v3445_v41 }
 0x10c   : > { %v831_v22 = vxor.u32 %v2937_v35, %v3447_v43  ;;  %v948_v24 = vmul.u32 3266489909, %v820_v4  ;;  %v956_v62 = vmul.u32 3266489909, %v828_v10  ;;  %v576_v38 = vshrl.u32 %v560_v51, 15 }
 0x10d   : > { %v3472_v12 = vxor.u32 %v710_v13, %v702_v29  ;;  %v952_v5 = vmul.u32 3266489909, %v824_v14  ;;  %v960_v0 = vmul.u32 3266489909, %v832_v47  ;;  %v3474_v56 = vxor.u32 %v714_v39, %v706_v23 }
 0x10e   : > { %v3476_v61 = vxor.u32 %v709_v6, %v701_v9  ;;  %v1076_v60 = vshrl.u32 %v948_v24, 16  ;;  %v1084_v58 = vshrl.u32 %v956_v62, 16  ;;  %v947_v33 = vmul.u32 3266489909, %v819_v50 }
 0x10f   : > { %v955_v57 = vmul.u32 3266489909, %v827_v40  ;;  %v1080_v1 = vshrl.u32 %v952_v5, 16  ;;  %v1088_v26 = vshrl.u32 %v960_v0, 16  ;;  %v951_v2 = vmul.u32 3266489909, %v823_v28 }
 0x110   : > { %v959_v8 = vmul.u32 3266489909, %v831_v22  ;;  %v1204_v43 = vxor.u32 %v1076_v60, %v948_v24  ;;  %v1212_v4 = vxor.u32 %v1084_v58, %v956_v62  ;;  %v1075_v10 = vshrl.u32 %v947_v33, 16 }
 0x111   : > { %v1083_v41 = vshrl.u32 %v955_v57, 16  ;;  %v1208_v29 = vxor.u32 %v1080_v1, %v952_v5  ;;  %v1216_v13 = vxor.u32 %v1088_v26, %v960_v0  ;;  %v1079_v14 = vshrl.u32 %v951_v2, 16 }
 0x112   : > { %v1087_v47 = vshrl.u32 %v959_v8, 16  ;;  %vm1332_vm8 = vcmp.ge.u32.totalorder %v1204_v43, 2147483648  ;;  %vm1340_vm9 = vcmp.ge.u32.totalorder %v1212_v4, 2147483648  ;;  %v1203_v9 = vxor.u32 %v1075_v10, %v947_v33 }
 0x113   : > { %v1211_v23 = vxor.u32 %v1083_v41, %v955_v57  ;;  %vm2151_vm10 = vmpackc.low %vm1340_vm9, %vm1332_vm8  ;;  %vm1336_vm11 = vcmp.ge.u32.totalorder %v1208_v29, 2147483648  ;;  %vm1344_vm12 = vcmp.ge.u32.totalorder %v1216_v13, 2147483648  ;;  %v1207_v39 = vxor.u32 %v1079_v14, %v951_v2  ;;  %v3916_v57 = vld [vmem:[#allocation18_spill] sm:$0xff]  ;;  %v3917_v2 = vld [vmem:[#allocation19_spill] sm:$0xff] }
 0x114   : > { %v1215_v6 = vxor.u32 %v1087_v47, %v959_v8  ;;  %v3914_v50 = vpack.c.bf16 %v3234_v27, %v3231_v18  ;;  %vm2247_vm13 = vmpackc.low %vm1344_vm12, %vm1336_vm11  ;;  %vm1331_vm14 = vcmp.ge.u32.totalorder %v1203_v9, 2147483648  ;;  %v592_v1 = vxor.u32 %v576_v38, %v560_v51 }
 0x115   : > { %vm1339_vm15 = vcmp.ge.u32.totalorder %v1211_v23, 2147483648  ;;  %v607_v26 = vmul.u32 2221713035, %v3454_v25  ;;  %v3915_v43 = vpack.c.bf16 %v3248_v32, %v3245_v11  ;;  %vm1335_vm1 = vcmp.ge.u32.totalorder %v1207_v39, 2147483648 }
 0x116   : > { %2152 = vmatprep.subr.msk.bf16.mxu1 %vm2151_vm10, %v3914_v50  ;;  %vm2154_vm0 = vmpackc.low %vm1339_vm15, %vm1331_vm14  ;;  %vm1343_vm2 = vcmp.ge.u32.totalorder %v1215_v6, 2147483648  ;;  %v726_v8 = vxor.u32 %v3472_v12, %v3916_v57  ;;  %v734_v18 = vxor.u32 %v3472_v12, %v3917_v2  ;;  %v3918_v27 = vpack.c.bf16 %v3261_v42, %v3258_v59 }
 0x117   : > { %2248 = vmatprep.subr.msk.bf16.mxu0 %vm2247_vm13, %v3915_v43  ;;  %vm2250_vm3 = vmpackc.low %vm1343_vm2, %vm1335_vm1  ;;  %v608_v33 = vmul.u32 2221713035, %v592_v1  ;;  %v623_v41 = vshrl.u32 %v607_v26, 16  ;;  %v730_v11 = vxor.u32 %v3474_v56, %v3916_v57  ;;  %v738_v32 = vxor.u32 %v3474_v56, %v3917_v2 }
 0x118   : > { %2155 = vmatpush1.bf16.xpose.msk.msra.mxu1 %vm2154_vm0, %v3918_v27  ;;  %v3919_v51 = vpack.c.bf16 %v3308_v3, %v3305_v53  ;;  %v854_v25 = vmul.u32 3266489909, %v726_v8  ;;  %v862_v40 = vmul.u32 3266489909, %v734_v18  ;;  %v725_v28 = vxor.u32 %v3476_v61, %v3916_v57 }
 0x119   : > { %v733_v59 = vxor.u32 %v3476_v61, %v3917_v2  ;;  %v624_v42 = vshrl.u32 %v608_v33, 16  ;;  %v3503_v22 = vxor.u32 %v623_v41, %v607_v26  ;;  %v858_v24 = vmul.u32 3266489909, %v730_v11 }
 0x11a   : > { %2251 = vmatpush1.bf16.xpose.msk.msra.mxu0 %vm2250_vm3, %v3919_v51  ;;  %v705_v62 = vmul.u32 2221713035, %v3452_v45  ;;  %v982_v38 = vshrl.u32 %v854_v25, 16  ;;  %v990_v5 = vshrl.u32 %v862_v40, 16  ;;  %v866_v0 = vmul.u32 3266489909, %v738_v32 }
 0x11b   : > { %v3506_v60 = vmul.u32 3266489909, %v725_v28  ;;  %v3508_v53 = vxor.u32 %v624_v42, %v608_v33  ;;  %v836_v3 = vxor.u32 %v2914_v52, %v3503_v22  ;;  %v840_v58 = vxor.u32 %v2927_v20, %v3503_v22 }
 0x11c   : > { %v835_v4 = vxor.u32 %v2935_v34, %v3503_v22  ;;  %v839_v10 = vxor.u32 %v2937_v35, %v3503_v22  ;;  %v3518_v29 = vxor.u32 %v982_v38, %v854_v25  ;;  %v986_v13 = vshrl.u32 %v858_v24, 16 }
 0x11d   : > { %v861_v14 = vmul.u32 3266489909, %v733_v59  ;;  %v844_v47 = vxor.u32 %v2914_v52, %v3508_v53  ;;  %v964_v9 = vmul.u32 3266489909, %v836_v3  ;;  %v848_v23 = vxor.u32 %v2927_v20, %v3508_v53 }
 0x11e   : > { %v968_v39 = vmul.u32 3266489909, %v840_v58  ;;  %v843_v6 = vxor.u32 %v2935_v34, %v3508_v53  ;;  %v963_v50 = vmul.u32 3266489909, %v835_v4  ;;  %v847_v1 = vxor.u32 %v2937_v35, %v3508_v53 }
 0x11f   : > { %v967_v26 = vmul.u32 3266489909, %v839_v10  ;;  %v972_v43 = vmul.u32 3266489909, %v844_v47  ;;  %v1092_v8 = vshrl.u32 %v964_v9, 16  ;;  %v1118_v3 = vxor.u32 %v990_v5, %v862_v40 }
 0x120   : > { %v976_v18 = vmul.u32 3266489909, %v848_v23  ;;  %v1096_v27 = vshrl.u32 %v968_v39, 16  ;;  %v971_v33 = vmul.u32 3266489909, %v843_v6  ;;  %v1091_v41 = vshrl.u32 %v963_v50, 16 }
 0x121   : > { %v975_v52 = vmul.u32 3266489909, %v847_v1  ;;  %v1095_v11 = vshrl.u32 %v967_v26, 16  ;;  %v1100_v32 = vshrl.u32 %v972_v43, 16  ;;  %v1220_v51 = vxor.u32 %v1092_v8, %v964_v9  ;;  %v3530_v9 = vld [vmem:[%s2815_s5 + $0x30] sm:$0xff]  ;;  %v300_v8 = vld [vmem:[%s2815_s5 + $0x98] sm:$0xff] }
 0x122   : > { %v1104_v20 = vshrl.u32 %v976_v18, 16  ;;  %v1224_v25 = vxor.u32 %v1096_v27, %v968_v39  ;;  %v1099_v28 = vshrl.u32 %v971_v33, 16  ;;  %v1219_v59 = vxor.u32 %v1091_v41, %v963_v50  ;;  %v3533_v23 = vld [vmem:[%s2815_s5 + $0x70] sm:$0xff] }
 0x123   : > { %v1103_v34 = vshrl.u32 %v975_v52, 16  ;;  %v1223_v42 = vxor.u32 %v1095_v11, %v967_v26  ;;  %v1228_v38 = vxor.u32 %v1100_v32, %v972_v43  ;;  %vm1348_vm4 = vcmp.ge.u32.totalorder %v1220_v51, 2147483648  ;;  %v3923_v50 = vld [vmem:[#allocation21_spill] sm:$0xff] }
 0x124   : > { %v1232_v35 = vxor.u32 %v1104_v20, %v976_v18  ;;  %vm1352_vm5 = vcmp.ge.u32.totalorder %v1224_v25, 2147483648  ;;  %v1227_v58 = vxor.u32 %v1099_v28, %v971_v33  ;;  %vm1347_vm6 = vcmp.ge.u32.totalorder %v1219_v59, 2147483648  ;;  %v409_v33 = vld [vmem:[#allocation5] sm:$0xff]  ;;  %v304_v51 = vld [vmem:[%s2815_s5 + $0xb8] sm:$0xff] }
 0x125   : > { %v1231_v4 = vxor.u32 %v1103_v34, %v975_v52  ;;  %vm1356_vm7 = vcmp.ge.u32.totalorder %v1228_v38, 2147483648  ;;  %vm1351_vm9 = vcmp.ge.u32.totalorder %v1223_v42, 2147483648  ;;  %vm1238_vm10 = vcmp.ge.u32.totalorder %v3518_v29, 2147483648  ;;  %v312_v34 = vld [vmem:[%s2815_s5 + $0xf8] sm:$0xff] }
 0x126   : > { %vm1360_vm8 = vcmp.ge.u32.totalorder %v1232_v35, 2147483648  ;;  %vm2157_vm11 = vmpackc.low %vm1356_vm7, %vm1348_vm4  ;;  %vm1355_vm12 = vcmp.ge.u32.totalorder %v1227_v58, 2147483648  ;;  %v994_v10 = vshrl.u32 %v866_v0, 16  ;;  %v1114_v47 = vxor.u32 %v986_v13, %v858_v24  ;;  %v418_v35 = vld [vmem:[#allocation5 + $0x48] sm:$0xff] }
 0x127   : > { %vm1359_vm13 = vcmp.ge.u32.totalorder %v1231_v4, 2147483648  ;;  %v3920_v40 = vpack.c.bf16 %v3315_v63, %v3312_v15  ;;  %vm2253_vm14 = vmpackc.low %vm1360_vm8, %vm1352_vm5  ;;  %vm1246_vm15 = vcmp.ge.u32.totalorder %v1118_v3, 2147483648  ;;  %v981_v5 = vshrl.u32 %v3506_v60, 16  ;;  %v3922_v15 = vld [vmem:[#allocation20_spill] sm:$0xff] }
 0x128   : > { %v989_v39 = vshrl.u32 %v861_v14, 16  ;;  %v713_v6 = vshrl.u32 %v705_v62, 16  ;;  %v3921_v24 = vpack.c.bf16 %v3324_v55, %v3321_v54  ;;  %vm2160_vm0 = vmpackc.low %vm1355_vm12, %vm1347_vm6  ;;  %v1122_v13 = vxor.u32 %v994_v10, %v866_v0  ;;  %v299_v4 = vld [vmem:[%s2815_s5 + $0x90] sm:$0xff]  ;;  %v422_v10 = vld [vmem:[#allocation5 + $0x68] sm:$0xff] }
 0x129   : > { %2158 = vmatprep.subr.msk.bf16.mxu1 %vm2157_vm11, %v3920_v40  ;;  %vm1242_vm1 = vcmp.ge.u32.totalorder %v1114_v47, 2147483648  ;;  %v742_v63 = vxor.u32 %v3472_v12, %v3922_v15  ;;  %v750_v1 = vxor.u32 %v3472_v12, %v3923_v50  ;;  %v3924_v26 = vpack.c.bf16 %v3336_v31, %v3333_v19  ;;  %vm2256_vm2 = vmpackc.low %vm1359_vm13, %vm1351_vm9  ;;  %v308_v19 = vld [vmem:[%s2815_s5 + $0xd8] sm:$0xff] }
 0x12a   : > { %2254 = vmatprep.subr.msk.bf16.mxu0 %vm2253_vm14, %v3921_v24  ;;  %v1109_v54 = vxor.u32 %v981_v5, %v3506_v60  ;;  %v1117_v55 = vxor.u32 %v989_v39, %v861_v14  ;;  %v3558_v0 = vxor.u32 %v713_v6, %v705_v62  ;;  %v2261_v43 = vpack.c.bf16 %v3533_v23, %v3530_v9  ;;  %vm2163_vm3 = vmpackc.low %vm1246_vm15, %vm1238_vm10  ;;  %v307_v39 = vld [vmem:[%s2815_s5 + $0xd0] sm:$0xff] }
 0x12b   : > { %2161 = vmatpush1.bf16.xpose.msk.msra.mxu1 %vm2160_vm0, %v3924_v26  ;;  %v3925_v18 = vpack.c.bf16 %v3387_v36, %v3384_v44  ;;  %vm1250_vm4 = vcmp.ge.u32.totalorder %v1122_v13, 2147483648  ;;  %v870_v31 = vmul.u32 3266489909, %v742_v63  ;;  %v878_v60 = vmul.u32 3266489909, %v750_v1  ;;  %v417_v13 = vld [vmem:[#allocation5 + $0x40] sm:$0xff] }
 0x12c   : > { %v746_v45 = vxor.u32 %v3474_v56, %v3922_v15  ;;  %v3926_v62 = vpack.c.bf16 %v3393_v37, %v3390_v17  ;;  %vm2259_vm5 = vmpackc.low %vm1250_vm4, %vm1242_vm1  ;;  %vm1237_vm6 = vcmp.ge.u32.totalorder %v1109_v54, 2147483648  ;;  %vm1245_vm7 = vcmp.ge.u32.totalorder %v1117_v55, 2147483648  ;;  %v3605_v55 = vld [vmem:[%s2815_s5 + $0xb0] sm:$0xff] }
 0x12d   : > { %2257 = vmatpush1.bf16.xpose.msk.msra.mxu0 %vm2256_vm2, %v3925_v18  ;;  %v729_v44 = vxor.u32 %v3558_v0, %v3916_v57  ;;  %v737_v36 = vxor.u32 %v3558_v0, %v3917_v2  ;;  %v3927_v29 = vpack.c.bf16 %v3409_v46, %v3406_v30  ;;  %v998_v14 = vshrl.u32 %v870_v31, 16  ;;  %vm3587_vm8 = vmpackc.low %vm1245_vm7, %vm1237_vm6  ;;  %v413_v30 = vld [vmem:[#allocation5 + $0x20] sm:$0xff] }
 0x12e   : > { %2164 = vmatprep.subr.msk.bf16.mxu1 %vm2163_vm3, %v3926_v62  ;;  %v1006_v27 = vshrl.u32 %v878_v60, 16  ;;  %v754_v17 = vxor.u32 %v3474_v56, %v3923_v50  ;;  %v874_v37 = vmul.u32 3266489909, %v746_v45  ;;  %v2168_v11 = vpack.c.bf16 %v308_v19, %v300_v8  ;;  %v311_v8 = vld [vmem:[%s2815_s5 + $0xf0] sm:$0xff]  ;;  %v421_v18 = vld [vmem:[#allocation5 + $0x60] sm:$0xff]  ;;  %v316_v62 = vld [vmem:[%s2815_s5 + $0x118] sm:$0xff] }
 0x12f   : > { %2260 = vmatprep.subr.msk.bf16.mxu0 %vm2259_vm5, %v3927_v29  ;;  %v857_v41 = vmul.u32 3266489909, %v729_v44  ;;  %v865_v52 = vmul.u32 3266489909, %v737_v36  ;;  %v741_v57 = vxor.u32 %v3476_v61, %v3922_v15  ;;  %v1126_v46 = vxor.u32 %v998_v14, %v870_v31  ;;  %v324_v44 = vld [vmem:[%s2815_s5 + $0x158] sm:$0xff]  ;;  %v3932_v14 = vld [vmem:[#allocation23_spill] sm:$0xff] }
 0x130   : > { %v1134_v32 = vxor.u32 %v1006_v27, %v878_v60  ;;  %v882_v20 = vmul.u32 3266489909, %v754_v17  ;;  %v1002_v25 = vshrl.u32 %v874_v37, 16  ;;  %v749_v42 = vxor.u32 %v3476_v61, %v3923_v50  ;;  %v416_v60 = vld [vmem:[#allocation5 + $0x38] sm:$0xff] }
 0x131   : > { %v985_v28 = vshrl.u32 %v857_v41, 16  ;;  %v993_v59 = vshrl.u32 %v865_v52, 16  ;;  %v869_v38 = vmul.u32 3266489909, %v741_v57  ;;  %vm1254_vm9 = vcmp.ge.u32.totalorder %v1126_v46, 2147483648  ;;  %v3931_v36 = vld [vmem:[#allocation22_spill] sm:$0xff] }
 0x132   : > { %1556 = vmatmul.mubr.f32.vlgmr.msra.gmra.mrb[0].mxu1 %v409_v33  ;;  %vm1262_vm10 = vcmp.ge.u32.totalorder %v1134_v32, 2147483648  ;;  %v1010_v3 = vshrl.u32 %v882_v20, 16  ;;  %v1130_v58 = vxor.u32 %v1002_v25, %v874_v37  ;;  %v3930_v47 = vpack.c.bf16 %v3431_v49, %v3428_v16  ;;  %v412_v49 = vld [vmem:[#allocation5 + $0x18] sm:$0xff] }
 0x133   : > { %v1113_v40 = vxor.u32 %v985_v28, %v857_v41  ;;  %v1121_v5 = vxor.u32 %v993_v59, %v865_v52  ;;  %vm2169_vm11 = vmpackc.low %vm1262_vm10, %vm1254_vm9  ;;  %v877_v6 = vmul.u32 3266489909, %v749_v42  ;;  %v997_v24 = vshrl.u32 %v869_v38, 16  ;;  %1560 = vmatprep.mubr.f32.mxu1 %v418_v35  ;;  %v320_v46 = vld [vmem:[%s2815_s5 + $0x138] sm:$0xff] }
 0x134   : > { %2167 = vmatpush1.bf16.xpose.msk.msra.mxu1 %vm3587_vm8, %v3930_v47  ;;  %1706 = vmatmul.mubr.f32.vlgmr.msra.gmra.mrb[0].mxu0 %v413_v30  ;;  %v1138_v63 = vxor.u32 %v1010_v3, %v882_v20  ;;  %vm1258_vm12 = vcmp.ge.u32.totalorder %v1130_v58, 2147483648  ;;  %v2264_v1 = vpack.c.bf16 %v312_v34, %v304_v51  ;;  %v745_v16 = vxor.u32 %v3558_v0, %v3922_v15  ;;  %v328_v32 = vld [vmem:[%s2815_s5 + $0x178] sm:$0xff] }
 0x135   : > { %2170 = vmatprep.subr.msk.bf16.mxu1 %vm2169_vm11, %v2168_v11  ;;  %vm1241_vm13 = vcmp.ge.u32.totalorder %v1113_v40, 2147483648  ;;  %vm1249_vm14 = vcmp.ge.u32.totalorder %v1121_v5, 2147483648  ;;  %v1005_v26 = vshrl.u32 %v877_v6, 16  ;;  %v1125_v54 = vxor.u32 %v997_v24, %v869_v38  ;;  %1710 = vmatprep.mubr.f32.mxu0 %v422_v10  ;;  %v323_v10 = vld [vmem:[%s2815_s5 + $0x150] sm:$0xff] }
 0x136   : > { %vm2262_vm15 = vmpackc.low %vm1249_vm14, %vm1241_vm13  ;;  %vm1266_vm0 = vcmp.ge.u32.totalorder %v1138_v63, 2147483648  ;;  %v2171_v19 = vpack.c.bf16 %v307_v39, %v299_v4  ;;  %v753_v31 = vxor.u32 %v3558_v0, %v3923_v50  ;;  %v873_v15 = vmul.u32 3266489909, %v745_v16  ;;  %1561 = vmatmul.mubr.f32.gmra.mrb[2].mxu1 %v417_v13  ;;  %v315_v4 = vld [vmem:[%s2815_s5 + $0x110] sm:$0xff] }
 0x137   : > { %2263 = vmatpush1.bf16.xpose.msk.msra.mxu0 %vm2262_vm15, %v2261_v43  ;;  %vm2265_vm1 = vmpackc.low %vm1266_vm0, %vm1258_vm12  ;;  %v1133_v45 = vxor.u32 %v1005_v26, %v877_v6  ;;  %vm1253_vm2 = vcmp.ge.u32.totalorder %v1125_v54, 2147483648  ;;  %v758_v29 = vxor.u32 %v3472_v12, %v3931_v36  ;;  %v766_v27 = vxor.u32 %v3472_v12, %v3932_v14  ;;  %1630 = vmatprep.mubr.f32.mxu1 %v412_v49  ;;  %v319_v6 = vld [vmem:[%s2815_s5 + $0x130] sm:$0xff] }
 0x138   : > { %2266 = vmatprep.subr.msk.bf16.mxu0 %vm2265_vm1, %v2264_v1  ;;  %v881_v50 = vmul.u32 3266489909, %v753_v31  ;;  %v1001_v17 = vshrl.u32 %v873_v15, 16  ;;  %v2267_v37 = vpack.c.bf16 %v311_v8, %v3605_v55  ;;  %v762_v9 = vxor.u32 %v3474_v56, %v3931_v36  ;;  %1711 = vmatmul.mubr.f32.gmra.mrb[2].mxu0 %v421_v18  ;;  %v327_v24 = vld [vmem:[%s2815_s5 + $0x170] sm:$0xff]  ;;  %v332_v8 = vld [vmem:[%s2815_s5 + $0x198] sm:$0xff] }
 0x139   : > { %vm1261_vm3 = vcmp.ge.u32.totalorder %v1133_v45, 2147483648  ;;  %v886_v23 = vmul.u32 3266489909, %v758_v29  ;;  %v894_v43 = vmul.u32 3266489909, %v766_v27  ;;  %v770_v33 = vxor.u32 %v3474_v56, %v3932_v14  ;;  %1780 = vmatprep.mubr.f32.mxu0 %v416_v60  ;;  %v340_v18 = vld [vmem:[%s2815_s5 + $0x1d8] sm:$0xff] }
 0x13a   : > { %vm2172_vm4 = vmpackc.low %vm1261_vm3, %vm1253_vm2  ;;  %v1009_v41 = vshrl.u32 %v881_v50, 16  ;;  %v1129_v52 = vxor.u32 %v1001_v17, %v873_v15  ;;  %v2174_v11 = vpack.c.bf16 %v324_v44, %v316_v62  ;;  %v890_v57 = vmul.u32 3266489909, %v762_v9 }
 0x13b   : > { %v1014_v2 = vshrl.u32 %v886_v23, 16  ;;  %v1022_v30 = vshrl.u32 %v894_v43, 16  ;;  %v898_v51 = vmul.u32 3266489909, %v770_v33  ;;  %v757_v20 = vxor.u32 %v3476_v61, %v3931_v36  ;;  %v336_v33 = vld [vmem:[%s2815_s5 + $0x1b8] sm:$0xff] }
 0x13c   : > { %2173 = vmatpush1.bf16.xpose.msk.msra.mxu1 %vm2172_vm4, %v2171_v19  ;;  %v1137_v25 = vxor.u32 %v1009_v41, %v881_v50  ;;  %vm1257_vm5 = vcmp.ge.u32.totalorder %v1129_v52, 2147483648  ;;  %v1018_v28 = vshrl.u32 %v890_v57, 16  ;;  %v765_v59 = vxor.u32 %v3476_v61, %v3932_v14  ;;  %v3933_v19 = vld [vmem:[#allocation24_spill] sm:$0xff]  ;;  %v344_v41 = vld [vmem:[%s2815_s5 + $0x1f8] sm:$0xff] }
 0x13d   : > { %v1142_v34 = vxor.u32 %v1014_v2, %v886_v23  ;;  %v1150_v42 = vxor.u32 %v1022_v30, %v894_v43  ;;  %v1026_v38 = vshrl.u32 %v898_v51, 16  ;;  %v885_v35 = vmul.u32 3266489909, %v757_v20  ;;  %v339_v20 = vld [vmem:[%s2815_s5 + $0x1d0] sm:$0xff] }
 0x13e   : > { %vm1265_vm6 = vcmp.ge.u32.totalorder %v1137_v25, 2147483648  ;;  %v1146_v3 = vxor.u32 %v1018_v28, %v890_v57  ;;  %v2270_v58 = vpack.c.bf16 %v328_v32, %v320_v46  ;;  %v893_v47 = vmul.u32 3266489909, %v765_v59 }
 0x13f   : > { %vm2268_vm7 = vmpackc.low %vm1265_vm6, %vm1257_vm5  ;;  %vm1270_vm8 = vcmp.ge.u32.totalorder %v1142_v34, 2147483648  ;;  %vm1278_vm9 = vcmp.ge.u32.totalorder %v1150_v42, 2147483648  ;;  %v1154_v40 = vxor.u32 %v1026_v38, %v898_v51  ;;  %v1013_v5 = vshrl.u32 %v885_v35, 16  ;;  %v331_v51 = vld [vmem:[%s2815_s5 + $0x190] sm:$0xff] }
 0x140   : > { %2269 = vmatpush1.bf16.xpose.msk.msra.mxu0 %vm2268_vm7, %v2267_v37  ;;  %vm2175_vm10 = vmpackc.low %vm1278_vm9, %vm1270_vm8  ;;  %vm1274_vm11 = vcmp.ge.u32.totalorder %v1146_v3, 2147483648  ;;  %v1021_v39 = vshrl.u32 %v893_v47, 16  ;;  %v761_v13 = vxor.u32 %v3558_v0, %v3931_v36  ;;  %v769_v63 = vxor.u32 %v3558_v0, %v3932_v14  ;;  %v343_v3 = vld [vmem:[%s2815_s5 + $0x1f0] sm:$0xff] }
 0x141   : > { %2176 = vmatprep.subr.msk.bf16.mxu1 %vm2175_vm10, %v2174_v11  ;;  %vm1282_vm12 = vcmp.ge.u32.totalorder %v1154_v40, 2147483648  ;;  %v1141_v1 = vxor.u32 %v1013_v5, %v885_v35  ;;  %v2177_v16 = vpack.c.bf16 %v323_v10, %v315_v4  ;;  %v774_v49 = vxor.u32 %v3472_v12, %v3166_v48  ;;  %v335_v35 = vld [vmem:[%s2815_s5 + $0x1b0] sm:$0xff] }
 0x142   : > { %vm2271_vm13 = vmpackc.low %vm1282_vm12, %vm1274_vm11  ;;  %v1149_v26 = vxor.u32 %v1021_v39, %v893_v47  ;;  %v889_v54 = vmul.u32 3266489909, %v761_v13  ;;  %v897_v55 = vmul.u32 3266489909, %v769_v63  ;;  %v782_v31 = vxor.u32 %v3472_v12, %v3933_v19  ;;  %v3934_v40 = vld [vmem:[#allocation25_spill] sm:$0xff]  ;;  %v3935_v13 = vld [vmem:[#allocation26_spill] sm:$0xff] }
 0x143   : > { %2272 = vmatprep.subr.msk.bf16.mxu0 %vm2271_vm13, %v2270_v58  ;;  %vm1269_vm14 = vcmp.ge.u32.totalorder %v1141_v1, 2147483648  ;;  %v2273_v15 = vpack.c.bf16 %v327_v24, %v319_v6  ;;  %v902_v60 = vmul.u32 3266489909, %v774_v49  ;;  %v778_v45 = vxor.u32 %v3474_v56, %v3166_v48  ;;  %v348_v6 = vld [vmem:[%s2815_s5 + $0x218] sm:$0xff] }
 0x144   : > { %vm1277_vm15 = vcmp.ge.u32.totalorder %v1149_v26, 2147483648  ;;  %v1017_v62 = vshrl.u32 %v889_v54, 16  ;;  %v1025_v44 = vshrl.u32 %v897_v55, 16  ;;  %v910_v36 = vmul.u32 3266489909, %v782_v31  ;;  %v356_v24 = vld [vmem:[%s2815_s5 + $0x258] sm:$0xff] }
 0x145   : > { %vm2178_vm0 = vmpackc.low %vm1277_vm15, %vm1269_vm14  ;;  %v1030_v29 = vshrl.u32 %v902_v60, 16  ;;  %v2180_v14 = vpack.c.bf16 %v340_v18, %v332_v8  ;;  %v786_v27 = vxor.u32 %v3474_v56, %v3933_v19  ;;  %v906_v50 = vmul.u32 3266489909, %v778_v45  ;;  %v352_v45 = vld [vmem:[%s2815_s5 + $0x238] sm:$0xff] }
 0x146   : > { %2179 = vmatpush1.bf16.xpose.msk.msra.mxu1 %vm2178_vm0, %v2177_v16  ;;  %v1145_v17 = vxor.u32 %v1017_v62, %v889_v54  ;;  %v1153_v37 = vxor.u32 %v1025_v44, %v897_v55  ;;  %v1038_v9 = vshrl.u32 %v910_v36, 16  ;;  %v773_v23 = vxor.u32 %v3476_v61, %v3166_v48  ;;  %v360_v62 = vld [vmem:[%s2815_s5 + $0x278] sm:$0xff] }
 0x147   : > { %v1158_v43 = vxor.u32 %v1030_v29, %v902_v60  ;;  %v914_v52 = vmul.u32 3266489909, %v786_v27  ;;  %v1034_v11 = vshrl.u32 %v906_v50, 16  ;;  %v781_v57 = vxor.u32 %v3476_v61, %v3933_v19 }
 0x148   : > { %vm1273_vm1 = vcmp.ge.u32.totalorder %v1145_v17, 2147483648  ;;  %vm1281_vm2 = vcmp.ge.u32.totalorder %v1153_v37, 2147483648  ;;  %v1166_v2 = vxor.u32 %v1038_v9, %v910_v36  ;;  %v901_v30 = vmul.u32 3266489909, %v773_v23  ;;  %v347_v37 = vld [vmem:[%s2815_s5 + $0x210] sm:$0xff] }
 0x149   : > { %vm2274_vm3 = vmpackc.low %vm1281_vm2, %vm1273_vm1  ;;  %vm1286_vm4 = vcmp.ge.u32.totalorder %v1158_v43, 2147483648  ;;  %v1042_v46 = vshrl.u32 %v914_v52, 16  ;;  %v1162_v32 = vxor.u32 %v1034_v11, %v906_v50  ;;  %v909_v25 = vmul.u32 3266489909, %v781_v57  ;;  %v355_v9 = vld [vmem:[%s2815_s5 + $0x250] sm:$0xff] }
 0x14a   : > { %2275 = vmatpush1.bf16.xpose.msk.msra.mxu0 %vm2274_vm3, %v2273_v15  ;;  %vm1294_vm5 = vcmp.ge.u32.totalorder %v1166_v2, 2147483648  ;;  %v2276_v28 = vpack.c.bf16 %v344_v41, %v336_v33  ;;  %v1029_v59 = vshrl.u32 %v901_v30, 16  ;;  %v777_v34 = vxor.u32 %v3558_v0, %v3166_v48 }
 0x14b   : > { %vm2181_vm6 = vmpackc.low %vm1294_vm5, %vm1286_vm4  ;;  %v1170_v42 = vxor.u32 %v1042_v46, %v914_v52  ;;  %vm1290_vm7 = vcmp.ge.u32.totalorder %v1162_v32, 2147483648  ;;  %v1037_v38 = vshrl.u32 %v909_v25, 16  ;;  %v785_v58 = vxor.u32 %v3558_v0, %v3933_v19  ;;  %v351_v32 = vld [vmem:[%s2815_s5 + $0x230] sm:$0xff] }
 0x14c   : > { %2182 = vmatprep.subr.msk.bf16.mxu1 %vm2181_vm6, %v2180_v14  ;;  %v1157_v4 = vxor.u32 %v1029_v59, %v901_v30  ;;  %v2183_v10 = vpack.c.bf16 %v339_v20, %v331_v51  ;;  %v905_v47 = vmul.u32 3266489909, %v777_v34  ;;  %v790_v5 = vxor.u32 %v3472_v12, %v3934_v40  ;;  %v359_v51 = vld [vmem:[%s2815_s5 + $0x270] sm:$0xff] }
 0x14d   : > { %vm1298_vm8 = vcmp.ge.u32.totalorder %v1170_v42, 2147483648  ;;  %v1165_v48 = vxor.u32 %v1037_v38, %v909_v25  ;;  %v913_v39 = vmul.u32 3266489909, %v785_v58  ;;  %v798_v63 = vxor.u32 %v3472_v12, %v3935_v13  ;;  %v364_v38 = vld [vmem:[%s2815_s5 + $0x298] sm:$0xff] }
 0x14e   : > { %vm2277_vm9 = vmpackc.low %vm1298_vm8, %vm1290_vm7  ;;  %vm1285_vm10 = vcmp.ge.u32.totalorder %v1157_v4, 2147483648  ;;  %v1033_v1 = vshrl.u32 %v905_v47, 16  ;;  %v2279_v16 = vpack.c.bf16 %v343_v3, %v335_v35  ;;  %v918_v49 = vmul.u32 3266489909, %v790_v5  ;;  %v372_v35 = vld [vmem:[%s2815_s5 + $0x2d8] sm:$0xff] }
 0x14f   : > { %2278 = vmatprep.subr.msk.bf16.mxu0 %vm2277_vm9, %v2276_v28  ;;  %vm1293_vm11 = vcmp.ge.u32.totalorder %v1165_v48, 2147483648  ;;  %v1041_v26 = vshrl.u32 %v913_v39, 16  ;;  %v926_v54 = vmul.u32 3266489909, %v798_v63  ;;  %v794_v55 = vxor.u32 %v3474_v56, %v3934_v40 }
 0x150   : > { %vm2184_vm12 = vmpackc.low %vm1293_vm11, %vm1285_vm10  ;;  %v1161_v8 = vxor.u32 %v1033_v1, %v905_v47  ;;  %v1046_v18 = vshrl.u32 %v918_v49, 16  ;;  %v2186_v19 = vpack.c.bf16 %v356_v24, %v348_v6  ;;  %v802_v31 = vxor.u32 %v3474_v56, %v3935_v13  ;;  %v368_v1 = vld [vmem:[%s2815_s5 + $0x2b8] sm:$0xff] }
 0x151   : > { %2185 = vmatpush1.bf16.xpose.msk.msra.mxu1 %vm2184_vm12, %v2183_v10  ;;  %v1169_v15 = vxor.u32 %v1041_v26, %v913_v39  ;;  %v1054_v60 = vshrl.u32 %v926_v54, 16  ;;  %v922_v44 = vmul.u32 3266489909, %v794_v55  ;;  %v789_v36 = vxor.u32 %v3476_v61, %v3934_v40 }
 0x152   : > { %vm1289_vm13 = vcmp.ge.u32.totalorder %v1161_v8, 2147483648  ;;  %v1174_v29 = vxor.u32 %v1046_v18, %v918_v49  ;;  %v930_v14 = vmul.u32 3266489909, %v802_v31  ;;  %v797_v27 = vxor.u32 %v3476_v61, %v3935_v13  ;;  %v363_v31 = vld [vmem:[%s2815_s5 + $0x290] sm:$0xff] }
 0x153   : > { %vm1297_vm14 = vcmp.ge.u32.totalorder %v1169_v15, 2147483648  ;;  %v1182_v50 = vxor.u32 %v1054_v60, %v926_v54  ;;  %v1050_v17 = vshrl.u32 %v922_v44, 16  ;;  %v917_v23 = vmul.u32 3266489909, %v789_v36  ;;  %v371_v15 = vld [vmem:[%s2815_s5 + $0x2d0] sm:$0xff] }
 0x154   : > { %vm2280_vm15 = vmpackc.low %vm1297_vm14, %vm1289_vm13  ;;  %vm1302_vm0 = vcmp.ge.u32.totalorder %v1174_v29, 2147483648  ;;  %v1058_v43 = vshrl.u32 %v930_v14, 16  ;;  %v2282_v33 = vpack.c.bf16 %v360_v62, %v352_v45  ;;  %v925_v41 = vmul.u32 3266489909, %v797_v27 }
 0x155   : > { %2281 = vmatpush1.bf16.xpose.msk.msra.mxu0 %vm2280_vm15, %v2279_v16  ;;  %vm1310_vm1 = vcmp.ge.u32.totalorder %v1182_v50, 2147483648  ;;  %v1178_v52 = vxor.u32 %v1050_v17, %v922_v44  ;;  %v1045_v11 = vshrl.u32 %v917_v23, 16  ;;  %v793_v57 = vxor.u32 %v3558_v0, %v3934_v40  ;;  %v376_v16 = vld [vmem:[%s2815_s5 + $0x2f8] sm:$0xff] }
 0x156   : > { %vm2187_vm2 = vmpackc.low %vm1310_vm1, %vm1302_vm0  ;;  %v1186_v2 = vxor.u32 %v1058_v43, %v930_v14  ;;  %v1053_v30 = vshrl.u32 %v925_v41, 16  ;;  %v2189_v46 = vpack.c.bf16 %v355_v9, %v347_v37  ;;  %v801_v20 = vxor.u32 %v3558_v0, %v3935_v13  ;;  %v367_v37 = vld [vmem:[%s2815_s5 + $0x2b0] sm:$0xff] }
 0x157   : > { %2188 = vmatprep.subr.msk.bf16.mxu1 %vm2187_vm2, %v2186_v19  ;;  %vm1306_vm3 = vcmp.ge.u32.totalorder %v1178_v52, 2147483648  ;;  %v1173_v25 = vxor.u32 %v1045_v11, %v917_v23  ;;  %v921_v28 = vmul.u32 3266489909, %v793_v57  ;;  %v806_v59 = vxor.u32 %v3472_v12, %v3352_v7  ;;  %v375_v9 = vld [vmem:[%s2815_s5 + $0x2f0] sm:$0xff]  ;;  %v380_v57 = vld [vmem:[%s2815_s5 + $0x318] sm:$0xff] }
 0x158   : > { %vm1314_vm4 = vcmp.ge.u32.totalorder %v1186_v2, 2147483648  ;;  %v1181_v34 = vxor.u32 %v1053_v30, %v925_v41  ;;  %v929_v42 = vmul.u32 3266489909, %v801_v20  ;;  %v814_v3 = vxor.u32 %v3472_v12, %v3364_v21  ;;  %v3936_v41 = vld [vmem:[#allocation16_spill] sm:$0xff]  ;;  %v388_v2 = vld [vmem:[%s2815_s5 + $0x358] sm:$0xff]  ;;  %v3937_v30 = vld [vmem:[#allocation27_spill] sm:$0xff] }
 0x159   : > { %vm2283_vm5 = vmpackc.low %vm1314_vm4, %vm1306_vm3  ;;  %vm1301_vm6 = vcmp.ge.u32.totalorder %v1173_v25, 2147483648  ;;  %v1049_v58 = vshrl.u32 %v921_v28, 16  ;;  %v2285_v4 = vpack.c.bf16 %v359_v51, %v351_v32  ;;  %v934_v10 = vmul.u32 3266489909, %v806_v59 }
 0x15a   : > { %2284 = vmatprep.subr.msk.bf16.mxu0 %vm2283_vm5, %v2282_v33  ;;  %vm1309_vm7 = vcmp.ge.u32.totalorder %v1181_v34, 2147483648  ;;  %v1057_v47 = vshrl.u32 %v929_v42, 16  ;;  %v942_v40 = vmul.u32 3266489909, %v814_v3  ;;  %v810_v5 = vxor.u32 %v3474_v56, %v3352_v7 }
 0x15b   : > { %vm2190_vm8 = vmpackc.low %vm1309_vm7, %vm1301_vm6  ;;  %v1177_v48 = vxor.u32 %v1049_v58, %v921_v28  ;;  %v1062_v39 = vshrl.u32 %v934_v10, 16  ;;  %v2192_v6 = vpack.c.bf16 %v372_v35, %v364_v38  ;;  %v818_v24 = vxor.u32 %v3474_v56, %v3364_v21  ;;  %v384_v58 = vld [vmem:[%s2815_s5 + $0x338] sm:$0xff] }
 0x15c   : > { %2191 = vmatpush1.bf16.xpose.msk.msra.mxu1 %vm2190_vm8, %v2189_v46  ;;  %v1185_v13 = vxor.u32 %v1057_v47, %v929_v42  ;;  %v1070_v63 = vshrl.u32 %v942_v40, 16  ;;  %v938_v49 = vmul.u32 3266489909, %v810_v5  ;;  %v805_v26 = vxor.u32 %v3476_v61, %v3352_v7 }
 0x15d   : > { %vm1305_vm9 = vcmp.ge.u32.totalorder %v1177_v48, 2147483648  ;;  %v1190_v54 = vxor.u32 %v1062_v39, %v934_v10  ;;  %v946_v55 = vmul.u32 3266489909, %v818_v24  ;;  %v813_v8 = vxor.u32 %v3476_v61, %v3364_v21  ;;  %v379_v24 = vld [vmem:[%s2815_s5 + $0x310] sm:$0xff] }
 0x15e   : > { %vm1313_vm10 = vcmp.ge.u32.totalorder %v1185_v13, 2147483648  ;;  %v1198_v18 = vxor.u32 %v1070_v63, %v942_v40  ;;  %v1066_v19 = vshrl.u32 %v938_v49, 16  ;;  %v933_v60 = vmul.u32 3266489909, %v805_v26  ;;  %v387_v13 = vld [vmem:[%s2815_s5 + $0x350] sm:$0xff] }
 0x15f   : > { %vm2286_vm11 = vmpackc.low %vm1313_vm10, %vm1305_vm9  ;;  %vm1318_vm12 = vcmp.ge.u32.totalorder %v1190_v54, 2147483648  ;;  %v1074_v45 = vshrl.u32 %v946_v55, 16  ;;  %v2288_v62 = vpack.c.bf16 %v376_v16, %v368_v1  ;;  %v941_v44 = vmul.u32 3266489909, %v813_v8 }
 0x160   : > { %2287 = vmatpush1.bf16.xpose.msk.msra.mxu0 %vm2286_vm11, %v2285_v4  ;;  %vm1326_vm13 = vcmp.ge.u32.totalorder %v1198_v18, 2147483648  ;;  %v1194_v36 = vxor.u32 %v1066_v19, %v938_v49  ;;  %v1061_v29 = vshrl.u32 %v933_v60, 16  ;;  %v809_v14 = vxor.u32 %v3558_v0, %v3352_v7  ;;  %v392_v4 = vld [vmem:[%s2815_s5 + $0x378] sm:$0xff] }
 0x161   : > { %vm2193_vm14 = vmpackc.low %vm1326_vm13, %vm1318_vm12  ;;  %v1202_v27 = vxor.u32 %v1074_v45, %v946_v55  ;;  %v1069_v50 = vshrl.u32 %v941_v44, 16  ;;  %v2195_v17 = vpack.c.bf16 %v371_v15, %v363_v31  ;;  %v817_v23 = vxor.u32 %v3558_v0, %v3364_v21  ;;  %v383_v31 = vld [vmem:[%s2815_s5 + $0x330] sm:$0xff] }
 0x162   : > { %2194 = vmatprep.subr.msk.bf16.mxu1 %vm2193_vm14, %v2192_v6  ;;  %vm1322_vm15 = vcmp.ge.u32.totalorder %v1194_v36, 2147483648  ;;  %v1189_v43 = vxor.u32 %v1061_v29, %v933_v60  ;;  %v937_v33 = vmul.u32 3266489909, %v809_v14  ;;  %v822_v52 = vxor.u32 %v3472_v12, %v3936_v41  ;;  %v391_v15 = vld [vmem:[%s2815_s5 + $0x370] sm:$0xff]  ;;  %v396_v14 = vld [vmem:[%s2815_s5 + $0x398] sm:$0xff] }
 0x163   : > { %vm1330_vm0 = vcmp.ge.u32.totalorder %v1202_v27, 2147483648  ;;  %v1197_v7 = vxor.u32 %v1069_v50, %v941_v44  ;;  %v945_v11 = vmul.u32 3266489909, %v817_v23  ;;  %v830_v46 = vxor.u32 %v3472_v12, %v3937_v30  ;;  %v404_v27 = vld [vmem:[%s2815_s5 + $0x3d8] sm:$0xff] }
 0x164   : > { %vm2289_vm1 = vmpackc.low %vm1330_vm0, %vm1322_vm15  ;;  %vm1317_vm2 = vcmp.ge.u32.totalorder %v1189_v43, 2147483648  ;;  %v1065_v32 = vshrl.u32 %v937_v33, 16  ;;  %v2291_v21 = vpack.c.bf16 %v375_v9, %v367_v37  ;;  %v950_v51 = vmul.u32 3266489909, %v822_v52 }
 0x165   : > { %2290 = vmatprep.subr.msk.bf16.mxu0 %vm2289_vm1, %v2288_v62  ;;  %vm1325_vm3 = vcmp.ge.u32.totalorder %v1197_v7, 2147483648  ;;  %v1073_v20 = vshrl.u32 %v945_v11, 16  ;;  %v958_v25 = vmul.u32 3266489909, %v830_v46  ;;  %v826_v28 = vxor.u32 %v3474_v56, %v3936_v41 }
 0x166   : > { %vm2196_vm4 = vmpackc.low %vm1325_vm3, %vm1317_vm2  ;;  %v1193_v59 = vxor.u32 %v1065_v32, %v937_v33  ;;  %v1078_v34 = vshrl.u32 %v950_v51, 16  ;;  %v2198_v42 = vpack.c.bf16 %v388_v2, %v380_v57  ;;  %v834_v38 = vxor.u32 %v3474_v56, %v3937_v30 }
 0x167   : > { %2197 = vmatpush1.bf16.xpose.msk.msra.mxu1 %vm2196_vm4, %v2195_v17  ;;  %v1201_v35 = vxor.u32 %v1073_v20, %v945_v11  ;;  %v1086_v3 = vshrl.u32 %v958_v25, 16  ;;  %v954_v10 = vmul.u32 3266489909, %v826_v28  ;;  %v821_v47 = vxor.u32 %v3476_v61, %v3936_v41  ;;  %v400_v20 = vld [vmem:[%s2815_s5 + $0x3b8] sm:$0xff] }
 0x168   : > { %vm1321_vm5 = vcmp.ge.u32.totalorder %v1193_v59, 2147483648  ;;  %v1206_v40 = vxor.u32 %v1078_v34, %v950_v51  ;;  %v962_v5 = vmul.u32 3266489909, %v834_v38  ;;  %v829_v48 = vxor.u32 %v3476_v61, %v3937_v30  ;;  %v395_v38 = vld [vmem:[%s2815_s5 + $0x390] sm:$0xff] }
 0x169   : > { %vm1329_vm6 = vcmp.ge.u32.totalorder %v1201_v35, 2147483648  ;;  %v1214_v39 = vxor.u32 %v1086_v3, %v958_v25  ;;  %v1082_v6 = vshrl.u32 %v954_v10, 16  ;;  %v949_v63 = vmul.u32 3266489909, %v821_v47  ;;  %v408_v25 = vld [vmem:[%s2815_s5 + $0x3f8] sm:$0xff]  ;;  %v403_v35 = vld [vmem:[%s2815_s5 + $0x3d0] sm:$0xff] }
 0x16a   : > { %vm2292_vm7 = vmpackc.low %vm1329_vm6, %vm1321_vm5  ;;  %vm1334_vm8 = vcmp.ge.u32.totalorder %v1206_v40, 2147483648  ;;  %v1090_v1 = vshrl.u32 %v962_v5, 16  ;;  %v2294_v16 = vpack.c.bf16 %v392_v4, %v384_v58  ;;  %v957_v49 = vmul.u32 3266489909, %v829_v48 }
 0x16b   : > { %2293 = vmatpush1.bf16.xpose.msk.msra.mxu0 %vm2292_vm7, %v2291_v21  ;;  %vm1342_vm9 = vcmp.ge.u32.totalorder %v1214_v39, 2147483648  ;;  %v1210_v26 = vxor.u32 %v1082_v6, %v954_v10  ;;  %v1077_v54 = vshrl.u32 %v949_v63, 16  ;;  %v825_v55 = vxor.u32 %v3558_v0, %v3936_v41 }
 0x16c   : > { %vm2199_vm10 = vmpackc.low %vm1342_vm9, %vm1334_vm8  ;;  %v1218_v8 = vxor.u32 %v1090_v1, %v962_v5  ;;  %v1085_v18 = vshrl.u32 %v957_v49, 16  ;;  %v2201_v19 = vpack.c.bf16 %v387_v13, %v379_v24  ;;  %v833_v60 = vxor.u32 %v3558_v0, %v3937_v30  ;;  %v407_v24 = vld [vmem:[%s2815_s5 + $0x3f0] sm:$0xff] }
 0x16d   : > { %2200 = vmatprep.subr.msk.bf16.mxu1 %vm2199_vm10, %v2198_v42  ;;  %vm1338_vm11 = vcmp.ge.u32.totalorder %v1210_v26, 2147483648  ;;  %v1205_v45 = vxor.u32 %v1077_v54, %v949_v63  ;;  %v953_v62 = vmul.u32 3266489909, %v825_v55  ;;  %v838_v44 = vxor.u32 %v3472_v12, %v3503_v22  ;;  %v415_v26 = vld [vmem:[#allocation5 + $0x30] sm:$0xff]  ;;  %v424_v55 = vld [vmem:[#allocation5 + $0x78] sm:$0xff] }
 0x16e   : > { %vm1346_vm12 = vcmp.ge.u32.totalorder %v1218_v8, 2147483648  ;;  %v1213_v36 = vxor.u32 %v1085_v18, %v957_v49  ;;  %v961_v29 = vmul.u32 3266489909, %v833_v60  ;;  %v846_v50 = vxor.u32 %v3472_v12, %v3508_v53  ;;  %v420_v49 = vld [vmem:[#allocation5 + $0x58] sm:$0xff]  ;;  %v419_v54 = vld [vmem:[#allocation5 + $0x50] sm:$0xff] }
 0x16f   : > { %vm2295_vm13 = vmpackc.low %vm1346_vm12, %vm1338_vm11  ;;  %vm1333_vm14 = vcmp.ge.u32.totalorder %v1205_v45, 2147483648  ;;  %v1081_v17 = vshrl.u32 %v953_v62, 16  ;;  %v2297_v37 = vpack.c.bf16 %v391_v15, %v383_v31  ;;  %v966_v9 = vmul.u32 3266489909, %v838_v44  ;;  %v423_v8 = vld [vmem:[#allocation5 + $0x70] sm:$0xff] }
 0x170   : > { %2296 = vmatprep.subr.msk.bf16.mxu0 %vm2295_vm13, %v2294_v16  ;;  %vm1341_vm15 = vcmp.ge.u32.totalorder %v1213_v36, 2147483648  ;;  %v1089_v23 = vshrl.u32 %v961_v29, 16  ;;  %v974_v43 = vmul.u32 3266489909, %v846_v50  ;;  %v842_v33 = vxor.u32 %v3474_v56, %v3503_v22  ;;  %v411_v16 = vld [vmem:[#allocation5 + $0x10] sm:$0xff] }
 0x171   : > { %vm2202_vm0 = vmpackc.low %vm1341_vm15, %vm1333_vm14  ;;  %v1209_v41 = vxor.u32 %v1081_v17, %v953_v62  ;;  %v1094_v52 = vshrl.u32 %v966_v9, 16  ;;  %v2204_v7 = vpack.c.bf16 %v404_v27, %v396_v14  ;;  %v850_v12 = vxor.u32 %v3474_v56, %v3508_v53  ;;  %v2107_v44 = vld [vmem:[%s249_s14] ss:$0 sm:$0xff] }
 0x172   : > { %2203 = vmatpush1.bf16.xpose.msk.msra.mxu1 %vm2202_vm0, %v2201_v19  ;;  %v1217_v11 = vxor.u32 %v1089_v23, %v961_v29  ;;  %v1102_v57 = vshrl.u32 %v974_v43, 16  ;;  %v970_v2 = vmul.u32 3266489909, %v842_v33  ;;  %v837_v30 = vxor.u32 %v3476_v61, %v3503_v22 }
 0x173   : > { %vm1337_vm1 = vcmp.ge.u32.totalorder %v1209_v41, 2147483648  ;;  %v1222_v46 = vxor.u32 %v1094_v52, %v966_v9  ;;  %v978_v32 = vmul.u32 3266489909, %v850_v12  ;;  %v845_v21 = vxor.u32 %v3476_v61, %v3508_v53 }
 0x174   : > { %vm1345_vm2 = vcmp.ge.u32.totalorder %v1217_v11, 2147483648  ;;  %v1230_v51 = vxor.u32 %v1102_v57, %v974_v43  ;;  %v1098_v56 = vshrl.u32 %v970_v2, 16  ;;  %v965_v28 = vmul.u32 3266489909, %v837_v30 }
 0x175   : > { %vm2298_vm3 = vmpackc.low %vm1345_vm2, %vm1337_vm1  ;;  %vm1350_vm4 = vcmp.ge.u32.totalorder %v1222_v46, 2147483648  ;;  %v1106_v59 = vshrl.u32 %v978_v32, 16  ;;  %v973_v34 = vmul.u32 3266489909, %v845_v21  ;;  %v841_v58 = vxor.u32 %v3558_v0, %v3503_v22  ;;  %v399_v22 = vld [vmem:[%s2815_s5 + $0x3b0] sm:$0xff] }
 0x176   : > { %2299 = vmatpush1.bf16.xpose.msk.msra.mxu0 %vm2298_vm3, %v2297_v37  ;;  %vm1358_vm5 = vcmp.ge.u32.totalorder %v1230_v51, 2147483648  ;;  %v1226_v42 = vxor.u32 %v1098_v56, %v970_v2  ;;  %v1093_v3 = vshrl.u32 %v965_v28, 16  ;;  %v2300_v4 = vpack.c.bf16 %v408_v25, %v400_v20 }
 0x177   : > { %vm2205_vm6 = vmpackc.low %vm1358_vm5, %vm1350_vm4  ;;  %v1234_v61 = vxor.u32 %v1106_v59, %v978_v32  ;;  %v1101_v10 = vshrl.u32 %v973_v34, 16  ;;  %v849_v47 = vxor.u32 %v3558_v0, %v3508_v53  ;;  %v969_v5 = vmul.u32 3266489909, %v841_v58 }
 0x178   : > { %2206 = vmatprep.subr.msk.bf16.mxu1 %vm2205_vm6, %v2204_v7  ;;  %vm1354_vm7 = vcmp.ge.u32.totalorder %v1226_v42, 2147483648  ;;  %v1221_v40 = vxor.u32 %v1093_v3, %v965_v28  ;;  %v2207_v39 = vpack.c.bf16 %v403_v35, %v395_v38  ;;  %v2303_v0 = vpack.c.bf16 %v407_v24, %v399_v22 }
 0x179   : > { %vm1362_vm8 = vcmp.ge.u32.totalorder %v1234_v61, 2147483648  ;;  %v1229_v48 = vxor.u32 %v1101_v10, %v973_v34  ;;  %v977_v6 = vmul.u32 3266489909, %v849_v47  ;;  %v1097_v13 = vshrl.u32 %v969_v5, 16 }
 0x17a   : > { %vm2301_vm9 = vmpackc.low %vm1362_vm8, %vm1354_vm7  ;;  %vm1349_vm10 = vcmp.ge.u32.totalorder %v1221_v40, 2147483648 }
 0x17b   : > { %2302 = vmatprep.subr.msk.bf16.mxu0 %vm2301_vm9, %v2300_v4  ;;  %vm1357_vm11 = vcmp.ge.u32.totalorder %v1229_v48, 2147483648  ;;  %v1105_v63 = vshrl.u32 %v977_v6, 16  ;;  %v1225_v1 = vxor.u32 %v1097_v13, %v969_v5 }
 0x17c   : > { %vm2208_vm12 = vmpackc.low %vm1357_vm11, %vm1349_vm10 }
 0x17d   : > { %2209 = vmatpush1.bf16.xpose.msk.msra.mxu1 %vm2208_vm12, %v2207_v39  ;;  %v1233_v53 = vxor.u32 %v1105_v63, %v977_v6  ;;  %vm1353_vm13 = vcmp.ge.u32.totalorder %v1225_v1, 2147483648 }
 0x17f   : > { %vm1361_vm14 = vcmp.ge.u32.totalorder %v1233_v53, 2147483648 }
 0x180   : > { %vm2304_vm15 = vmpackc.low %vm1361_vm14, %vm1353_vm13 }
 0x181   : > { %2305 = vmatpush1.bf16.xpose.msk.msra.mxu0 %vm2304_vm15, %v2303_v0 }
 0x184   : > { %1631 = vmatmul.mubr.f32.vlgmr.msra.gmra.mrb[0].mxu1 %v411_v16 }
 0x185   : > { %1635 = vmatprep.mubr.f32.mxu1 %v420_v49 }
 0x188   : > { %1781 = vmatmul.mubr.f32.vlgmr.msra.gmra.mrb[0].mxu0 %v415_v26  ;;  %1636 = vmatmul.mubr.f32.gmra.mrb[2].mxu1 %v419_v54 }
 0x189   : > { %1785 = vmatprep.mubr.f32.mxu0 %v424_v55 }
 0x18c   : > { %1786 = vmatmul.mubr.f32.gmra.mrb[2].mxu0 %v423_v8 }
 0x257   : > { %v1632_v18 = vpop.f32.mrb[0].mxu1 }
 0x258   : > { %v1634_v19 = vpop.f32.mrb[1].mxu1 }
 0x25b   : > { %v1782_v31 = vpop.f32.mrb[0].mxu0  ;;  %v1637_v15 = vpop.f32.mrb[2].mxu1 }
 0x25c   : > { %v2306_v60 = vadd.f32 %v1782_v31, %v1632_v18  ;;  %v1784_v45 = vpop.f32.mrb[1].mxu0  ;;  %v1639_v62 = vpop.f32.mrb[3].mxu1 }
 0x25e   : > { %v1812_v36 = vmul.f32 2.0, %v2306_v60 }
 0x25f   : > { %v1787_v29 = vpop.f32.mrb[2].mxu0 }
 0x260   : > { %v1821_v14 = vadd.f32 %v2107_v44, %v1812_v36  ;;  %v2307_v27 = vadd.f32 %v1787_v29, %v1637_v15  ;;  %v1789_v50 = vpop.f32.mrb[3].mxu0 }
 0x262   : > { %1823 = vst [vmem:[%s275_s24] sm:$0xff] %v1821_v14  ;;  %v1813_v17 = vmul.f32 2.0, %v2307_v27 }
 0x264   : > { %v1822_v37 = vadd.f32 %v2107_v44, %v1813_v17 }
 0x266   : > { %1824 = vst [vmem:[%s275_s24 + $0x8] sm:$0xff] %v1822_v37 }
 0x267   : > { %2500 = shalt.err (!%p2497_p2)
}
 0x268   : > { %s2501_s20 = scalar_lea.hbm %s3770_s2, 256  ;;  %s2505_s13 = scalar_lea.hbm %s3822_s4, 1280 }
 0x269   : > { %p2502_p4 = scmp.ne.s32.totalorder %s3770_s2, %s2501_s20  ;;  %p2506_p5 = scmp.lt.u32.totalorder %s3770_s2, %s3822_s4 }
 0x26a   : > { %p2507_p7 = scmp.lt.u32.totalorder %s2505_s13, %s2501_s20  ;;  %p2509_p9 = scmp.lt.u32.totalorder %s2501_s20, %s3770_s2 }
 0x26b   : > { %p2503_p11 = pnand %p2502_p4, %p3938_p12 }
 0x26c   : > { %p2508_p0 = por %p2507_p7, %p2506_p5 }
 0x26d   : > { %p2504_p8 = pneg %p2503_p11 }
 0x26e   : > { %p2510_p13 = por %p2509_p9, %p2508_p0 }
 0x270   : > { %p2511_p6 = pnand %p2510_p13, %p2504_p8 }
 0x272   : > { %2514 = shalt.err (!%p2511_p6)
}
 0x273   : > { %s2581_s15 = smov 128   ;;  %s2582_s14 = smov 640  }
 0x274   : > { %s2583_s24 = smov 8  }
 0x275   : > { %2324 = dma.vmem_to_hbm [thread:$0]  (%p3938_p12), %s3763_s27, 256, %s3770_s2, %s1826_s11, %s2581_s15, %s2582_s14, %s2583_s24  }
 0x276 PF: > { %p2344_p3 = scmp.ge.s32.totalorder %s2573_s22, 2  ;;  %s1856_s26 = sand.u32 1, %s2553_s17  }
 0x277   : > { %p3939_p1 = scmp.ne.s32.totalorder %s3861_s9, 0  ;;  %s1857_s10 = scalar_lea.sflag [#allocation7], %s1856_s26 }
 0x279   : > { %p2338_p10 = pnand %p2344_p3, %p3939_p1 }
 0x27b   : > { %2548 = dma.done.wait (!%p2338_p10), %s1857_s10, 256  }
 0x27c   : > { %2550 = vsyncadd (!%p2338_p10), %s1857_s10, 4294967040  ;;  %s22_s22 = sadd.s32 1, %s2573_s22   ;;  %s3940_s17 = smov %s2557_s18 }
 0x27d   : > { %p19_p2 = scmp.ge.s32.totalorder %s22_s22, 7   ;;  %s3941_s18 = smov %s2561_s19 }
 0x27e   : > { %s3942_s19 = smov %s2662_s28  ;;  %s3943_s20 = smov %s2569_s21 }
 0x27f   : > { %s3944_s21 = smov %s3946_s0  ;;  %21 = sbr.rel (!%p19_p2) target bundleno = 10 (0xa), region = 106 }
 0x286   :  { %1862 = vsyncpa [#allocation6], 1 }
 0x287   :  { %1864 = vsyncpa [#allocation6 + $0x1], 1 }
 0x288   :  { %1865 = vsyncpa [#allocation9], 1 }
 0x289   :  { %1867 = vsyncpa [#allocation9 + $0x1], 1 }
 0x28a   :  { %1868 = vsyncpa [#allocation7], 1 }
 0x28b   :  { %1870 = vsyncpa [#allocation7 + $0x1], 1 }

</bundles_post_ra>
